<compile_context>
chip_gen: v7x
topology: tpu7x:2x2x1
jax: 0.10.0
libtpu: 0.0.40
codegen_flags: <defaults>
</compile_context>

<pallas_src>
import functools

import jax
import jax.numpy as jnp
from jax.experimental import pallas as pl
from jax.experimental.pallas import tpu as pltpu

LN_EPS = 1e-5                      # torch.nn.LayerNorm default
HIGH = jax.lax.Precision.HIGHEST   # used only by the pure-JAX reference


# ----------------------------------------------------------------------------
# Kernel 1: fused LN1 + Q/[K|V] projections + both attention passes + proj
#           + alpha-residual, one combined output per batch element.
# ----------------------------------------------------------------------------
def _attn_block_kernel(*refs, num_heads, scale, alpha, n_grid, has_conf):
    if has_conf:
        (xg_ref, xa_ref, sg_ref, sa_ref, cg_ref, ca_ref,
         g1_ref, b1_ref, wq_ref, wkv_ref, wp_ref, bp_ref, o_ref) = refs
    else:
        (xg_ref, xa_ref, sg_ref, sa_ref,
         g1_ref, b1_ref, wq_ref, wkv_ref, wp_ref, bp_ref, o_ref) = refs
        cg_ref = ca_ref = None

    C = xg_ref.shape[-1]
    H = num_heads
    d = C // H
    Ng = n_grid
    Na = xa_ref.shape[1]
    Nt = Ng + Na

    xg = xg_ref[0].astype(jnp.float32)        # (Ng, C) residual input (grid)
    xa = xa_ref[0].astype(jnp.float32)        # (Na, C) residual input (ada)
    sg = sg_ref[0].astype(jnp.float32)        # (Ng, C) source (grid)
    sa = sa_ref[0].astype(jnp.float32)        # (Na, C) source (ada)

    gamma = g1_ref[...].astype(jnp.float32)   # (1, C)
    beta = b1_ref[...].astype(jnp.float32)    # (1, C)

    # --- one fused LayerNorm over all four streams (sublane/row concat) -----
    slab = jnp.concatenate([xg, xa, sg, sa], axis=0)        # (2*Nt, C)
    mu = jnp.mean(slab, axis=-1, keepdims=True)
    slab_c = slab - mu
    var = jnp.mean(slab_c * slab_c, axis=-1, keepdims=True)
    normed = slab_c * jax.lax.rsqrt(var + LN_EPS) * gamma + beta

    src_n = normed[Nt:]                        # LN'd [xs_grid ; xs_ada], (Nt, C)
    if has_conf:
        conf = jnp.concatenate([cg_ref[0].astype(jnp.float32),
                                ca_ref[0].astype(jnp.float32)], axis=0)
        src_n = src_n * conf                   # broadcast over lanes (conf lane dim 1)

    wkv = wkv_ref[...]                         # (C, 2C) bf16 packed [K|V]
    bp = bp_ref[...].astype(jnp.float32)       # (1, C)

    def mm(a, w):                              # bf16 operands, f32 accumulate
        return jnp.dot(a.astype(jnp.bfloat16), w,
                       preferred_element_type=jnp.float32)

    def attn_proj(q_all, kv_all):
        # q_all: (Nq, C) f32, kv_all: (Ns, 2C) f32.
        # Returns proj(multi-head-attn) (Nq, C) f32 (bias included).
        k_t = kv_all[:, :C].T.astype(jnp.bfloat16)   # ONE transpose per pass, (C, Ns)
        v_b = kv_all[:, C:].astype(jnp.bfloat16)     # (Ns, C)
        q_b = (q_all * scale).astype(jnp.bfloat16)   # fold softmax scale into Q
        acc = None
        for h in range(H):                           # static per-head loop
            sl = slice(h * d, (h + 1) * d)
            s = jnp.dot(q_b[:, sl], k_t[sl, :],
                        preferred_element_type=jnp.float32)       # (Nq, Ns) f32
            s = s - jnp.max(s, axis=-1, keepdims=True)
            p = jnp.exp(s)
            p = p * pl.reciprocal(jnp.sum(p, axis=-1, keepdims=True),
                                  approx=True)
            o_h = jnp.dot(p.astype(jnp.bfloat16), v_b[:, sl],
                          preferred_element_type=jnp.float32)     # (Nq, d)
            # Fold the per-head output straight into the output projection
            # (no lane concat): proj(concat_h o_h) == sum_h o_h @ Wp[h*d:(h+1)*d].
            contrib = jnp.dot(o_h.astype(jnp.bfloat16), wp_ref[sl, :],
                              preferred_element_type=jnp.float32)  # (Nq, C)
            acc = contrib if acc is None else acc + contrib
        return acc + bp

    # Fused Q projection for grid+ada queries, packed K|V for the sources.
    q_all = mm(normed[:Nt], wq_ref[...])       # (Nt, C)
    kv = mm(src_n, wkv)                        # (Nt, 2C)

    # ---- forward_grid: attention of x_grid over the concatenated sources ----
    y_g = attn_proj(q_all[:Ng], kv)            # (Ng, C), pre-residual / pre-alpha
    # ---- forward_ada: attention of x_ada over y_grid (k2=k, v2=v) -----------
    kv2 = mm(y_g, wkv)                         # (Ng, 2C)
    y_a = attn_proj(q_all[Ng:], kv2)           # (Na, C)

    o_ref[0, :Ng, :] = (xg + alpha * y_g).astype(o_ref.dtype)
    o_ref[0, Ng:, :] = (xa + alpha * y_a).astype(o_ref.dtype)


# ----------------------------------------------------------------------------
# Kernel 2: LN2 + fc1 + GELU + fc2 + alpha-residual (row-tiled, weights
#           resident) -- one launch over the combined (grid+ada) row slab.
# ----------------------------------------------------------------------------
def _mlp_block_kernel(x_ref, g_ref, b_ref, w1_ref, b1_ref, w2_ref, b2_ref,
                      o_ref, *, alpha):
    x = x_ref[...].astype(jnp.float32)                # (TM, C)
    gamma = g_ref[...].astype(jnp.float32)
    beta = b_ref[...].astype(jnp.float32)
    mu = jnp.mean(x, axis=-1, keepdims=True)
    xc = x - mu
    var = jnp.mean(xc * xc, axis=-1, keepdims=True)
    z = xc * jax.lax.rsqrt(var + LN_EPS) * gamma + beta

    h = jnp.dot(z.astype(jnp.bfloat16), w1_ref[...],
                preferred_element_type=jnp.float32) + b1_ref[...].astype(jnp.float32)
    h = jax.nn.gelu(h, approximate=False)             # exact GELU (nn.GELU)
    y = jnp.dot(h.astype(jnp.bfloat16), w2_ref[...],
                preferred_element_type=jnp.float32) + b2_ref[...].astype(jnp.float32)
    o_ref[...] = (x + alpha * y).astype(o_ref.dtype)


# ----------------------------------------------------------------------------
# Wrappers
# ----------------------------------------------------------------------------
def attention_block(p, x_grid, x_ada, xs_grid, xs_ada, conf, *, num_heads, alpha):
    B, Ng, C = x_grid.shape
    Na = x_ada.shape[1]
    Nt = Ng + Na
    scale = (C // num_heads) ** -0.5
    has_conf = conf is not None and conf[1] is not None

    wq = p["q_w"].astype(jnp.bfloat16)
    wkv = jnp.concatenate([p["k_w"], p["v_w"]], axis=1).astype(jnp.bfloat16)
    wp = p["proj_w"].astype(jnp.bfloat16)

    seq = lambda n, c: pl.BlockSpec((1, n, c), lambda b: (b, 0, 0))
    full2 = lambda r, c: pl.BlockSpec((r, c), lambda b: (0, 0))

    inputs = [x_grid, x_ada, xs_grid, xs_ada]
    in_specs = [seq(Ng, C), seq(Na, C), seq(Ng, C), seq(Na, C)]
    if has_conf:
        cg = jnp.asarray(conf[0]).astype(jnp.float32)   # compact (B, Ng, 1) / (B, Ng, C)
        ca = jnp.asarray(conf[1]).astype(jnp.float32)   # compact (B, Na, 1) / (B, Na, C)
        inputs += [cg, ca]
        in_specs += [seq(Ng, cg.shape[-1]), seq(Na, ca.shape[-1])]
    inputs += [p["norm1_g"].reshape(1, C), p["norm1_b"].reshape(1, C),
               wq, wkv, wp, p["proj_b"].reshape(1, C)]
    in_specs += [full2(1, C), full2(1, C), full2(C, C), full2(C, 2 * C),
                 full2(C, C), full2(1, C)]

    out = pl.pallas_call(
        functools.partial(_attn_block_kernel, num_heads=num_heads, scale=scale,
                          alpha=alpha, n_grid=Ng, has_conf=has_conf),
        out_shape=jax.ShapeDtypeStruct((B, Nt, C), x_grid.dtype),
        grid=(B,),
        in_specs=in_specs,
        out_specs=seq(Nt, C),
        compiler_params=pltpu.CompilerParams(
            dimension_semantics=("parallel",),
            vmem_limit_bytes=64 * 1024 * 1024),
    )(*inputs)
    return out                                          # (B, Ng+Na, C)


def mlp_residual(x, g, b, w1, b1, w2, b2, *, alpha, row_tile=1024):
    orig_shape = x.shape
    C = orig_shape[-1]
    Hd = w1.shape[1]
    x2 = x.reshape(-1, C)
    M = x2.shape[0]
    tm = M if M <= row_tile else row_tile   # full slab at toy shapes, tiled at scale

    out = pl.pallas_call(
        functools.partial(_mlp_block_kernel, alpha=alpha),
        out_shape=jax.ShapeDtypeStruct((M, C), x.dtype),
        grid=(pl.cdiv(M, tm),),
        in_specs=[
            pl.BlockSpec((tm, C), lambda i: (i, 0)),
            pl.BlockSpec((1, C), lambda i: (0, 0)),
            pl.BlockSpec((1, C), lambda i: (0, 0)),
            pl.BlockSpec((C, Hd), lambda i: (0, 0)),    # resident weights
            pl.BlockSpec((1, Hd), lambda i: (0, 0)),
            pl.BlockSpec((Hd, C), lambda i: (0, 0)),
            pl.BlockSpec((1, C), lambda i: (0, 0)),
        ],
        out_specs=pl.BlockSpec((tm, C), lambda i: (i, 0)),
        compiler_params=pltpu.CompilerParams(
            dimension_semantics=("parallel",),
            vmem_limit_bytes=64 * 1024 * 1024),
    )(x2, g.reshape(1, C), b.reshape(1, C),
      w1.astype(jnp.bfloat16), b1.reshape(1, Hd),
      w2.astype(jnp.bfloat16), b2.reshape(1, C))
    return out.reshape(orig_shape)


def myblock2_forward(p, x, x_source, conf=(None, None), *, num_heads, alpha=1.0,
                     stream_dtype=jnp.bfloat16):
    x_grid, x_ada = x
    B, Ng, C = x_grid.shape
    Na = x_ada.shape[1]
    cast = lambda t: t.astype(stream_dtype)
    # Attention half -> single combined (B, Ng+Na, C) stream.
    y = attention_block(p, cast(x_grid), cast(x_ada),
                        cast(x_source[0]), cast(x_source[1]), conf,
                        num_heads=num_heads, alpha=alpha)
    # MLP half: one launch over all B*(Ng+Na) rows of both streams.
    y = mlp_residual(y, p["norm2_g"], p["norm2_b"],
                     p["fc1_w"], p["fc1_b"], p["fc2_w"], p["fc2_b"], alpha=alpha)
    return y[:, :Ng], y[:, Ng:]


# ----------------------------------------------------------------------------
# Pure-JAX f32 reference (correctness check; supports the conf path too)
# ----------------------------------------------------------------------------
def ref_forward(p, x, x_source, conf=(None, None), *, num_heads, alpha=1.0):
    def ln(t, g, b):
        mu = jnp.mean(t, -1, keepdims=True)
        var = jnp.mean((t - mu) ** 2, -1, keepdims=True)
        return (t - mu) / jnp.sqrt(var + LN_EPS) * g + b

    def lin(t, w, b=None):
        y = jnp.dot(t, w, precision=HIGH)
        return y + b if b is not None else y

    def mha(q, k, v, scale):
        B, Nq, C = q.shape
        Ns = k.shape[1]
        d = C // num_heads
        qh = q.reshape(B, Nq, num_heads, d).transpose(0, 2, 1, 3)
        kh = k.reshape(B, Ns, num_heads, d).transpose(0, 2, 1, 3)
        vh = v.reshape(B, Ns, num_heads, d).transpose(0, 2, 1, 3)
        a = jnp.einsum("bhqd,bhkd->bhqk", qh, kh, precision=HIGH) * scale
        a = jax.nn.softmax(a, axis=-1)
        o = jnp.einsum("bhqk,bhkd->bhqd", a, vh, precision=HIGH)
        return o.transpose(0, 2, 1, 3).reshape(B, Nq, C)

    x_grid, x_ada = x
    dim = x_grid.shape[-1]
    scale = (dim // num_heads) ** -0.5
    xg_n = ln(x_grid, p["norm1_g"], p["norm1_b"])
    xa_n = ln(x_ada, p["norm1_g"], p["norm1_b"])
    xs = jnp.concatenate([ln(x_source[0], p["norm1_g"], p["norm1_b"]),
                          ln(x_source[1], p["norm1_g"], p["norm1_b"])], axis=1)
    if conf is not None and conf[1] is not None:
        xs = xs * jnp.concatenate(conf, axis=1)
    o = mha(lin(xg_n, p["q_w"]), lin(xs, p["k_w"]), lin(xs, p["v_w"]), scale)
    y_grid = lin(o, p["proj_w"], p["proj_b"])
    o2 = mha(lin(xa_n, p["q_w"]), lin(y_grid, p["k_w"]), lin(y_grid, p["v_w"]), scale)
    y_ada = lin(o2, p["proj_w"], p["proj_b"])
    x_grid = x_grid + y_grid * alpha
    x_ada = x_ada + y_ada * alpha

    def mlp(t):
        h = jax.nn.gelu(lin(t, p["fc1_w"], p["fc1_b"]), approximate=False)
        return lin(h, p["fc2_w"], p["fc2_b"])

    x_grid = x_grid + mlp(ln(x_grid, p["norm2_g"], p["norm2_b"])) * alpha
    x_ada = x_ada + mlp(ln(x_ada, p["norm2_g"], p["norm2_b"])) * alpha
    return x_grid, x_ada


# ----------------------------------------------------------------------------
def init_params(key, dim, mlp_hidden):
    ks = jax.random.split(key, 12)
    n = lambda k, s: (0.02 * jax.random.normal(k, s)).astype(jnp.float32)
    return {
        "norm1_g": 1.0 + n(ks[0], (dim,)),
        "norm1_b": n(ks[1], (dim,)),
        "q_w": n(ks[2], (dim, dim)),
        "k_w": n(ks[3], (dim, dim)),
        "v_w": n(ks[4], (dim, dim)),
        "proj_w": n(ks[5], (dim, dim)),
        "proj_b": n(ks[6], (dim,)),
        "norm2_g": 1.0 + n(ks[7], (dim,)),
        "norm2_b": n(ks[8], (dim,)),
        "fc1_w": n(ks[9], (dim, mlp_hidden)),
        "fc1_b": n(ks[10], (mlp_hidden,)),
        "fc2_w": n(ks[11], (mlp_hidden, dim)),
        "fc2_b": jnp.zeros((dim,), jnp.float32),
    }


if __name__ == "__main__":
    B, N_grid, N_ada, dim, heads = 2, 8, 8, 32, 4
    mlp_hidden = int(dim * 4.0)
    alpha = 1.0

    key = jax.random.PRNGKey(0)
    kp, k1, k2, k3, k4, k5, k6 = jax.random.split(key, 7)
    params = init_params(kp, dim, mlp_hidden)

    x_grid = jax.random.normal(k1, (B, N_grid, dim), jnp.float32)
    x_ada = jax.random.normal(k2, (B, N_ada, dim), jnp.float32)
    xs_grid = jax.random.normal(k3, (B, N_grid, dim), jnp.float32)
    xs_ada = jax.random.normal(k4, (B, N_ada, dim), jnp.float32)
    conf_g = jax.nn.sigmoid(jax.random.normal(k5, (B, N_grid, 1), jnp.float32))
    conf_a = jax.nn.sigmoid(jax.random.normal(k6, (B, N_ada, 1), jnp.float32))

    # The kernels consume bf16 activation streams; the f32 reference is fed the
    # same bf16-rounded values so only matmul / softmax precision differs.
    rt = lambda t: t.astype(jnp.bfloat16).astype(jnp.float32)
    xg_r, xa_r, sg_r, sa_r = rt(x_grid), rt(x_ada), rt(xs_grid), rt(xs_ada)

    for conf in ((None, None), (conf_g, conf_a)):
        out_g, out_a = myblock2_forward(
            params, (x_grid, x_ada), (xs_grid, xs_ada), conf,
            num_heads=heads, alpha=alpha)
        jax.block_until_ready((out_g, out_a))

        ref_g, ref_a = ref_forward(
            params, (xg_r, xa_r), (sg_r, sa_r), conf,
            num_heads=heads, alpha=alpha)

        assert out_g.shape == (B, N_grid, dim) and out_a.shape == (B, N_ada, dim)
        # bf16 streams + bf16 MXU operands (f32 accumulation) + approx
        # reciprocal vs f32 reference -> a few 1e-3 relative; 2e-2 is safe.
        assert jnp.allclose(out_g.astype(jnp.float32), ref_g, atol=2e-2, rtol=2e-2)
        assert jnp.allclose(out_a.astype(jnp.float32), ref_a, atol=2e-2, rtol=2e-2)

    print("KERNEL_OK")
</pallas_src>

<mosaic_0001>
module attributes {stable_mosaic.version = 11 : i64} {
  func.func @_attn_block_kernel(%arg0: i32, %arg1: memref<1x8x32xbf16, #tpu.memory_space<vmem>>, %arg2: memref<1x8x32xbf16, #tpu.memory_space<vmem>>, %arg3: memref<1x8x32xbf16, #tpu.memory_space<vmem>>, %arg4: memref<1x8x32xbf16, #tpu.memory_space<vmem>>, %arg5: memref<1x32xf32, #tpu.memory_space<vmem>>, %arg6: memref<1x32xf32, #tpu.memory_space<vmem>>, %arg7: memref<32x32xbf16, #tpu.memory_space<vmem>>, %arg8: memref<32x64xbf16, #tpu.memory_space<vmem>>, %arg9: memref<32x32xbf16, #tpu.memory_space<vmem>>, %arg10: memref<1x32xf32, #tpu.memory_space<vmem>>, %arg11: memref<1x16x32xbf16, #tpu.memory_space<vmem>>) attributes {dimension_semantics = [#tpu.dimension_semantics<parallel>], iteration_bounds = array<i64: 2>, scalar_prefetch = 0 : i64, scratch_operands = 0 : i64, tpu.core_type = #tpu.core_type<tc>, window_params = [{transform_indices = @transform_0, window_bounds = array<i64: 1, 8, 32>}, {transform_indices = @transform_1, window_bounds = array<i64: 1, 8, 32>}, {transform_indices = @transform_2, window_bounds = array<i64: 1, 8, 32>}, {transform_indices = @transform_3, window_bounds = array<i64: 1, 8, 32>}, {pipeline_mode = #tpu.pipeline_mode<synchronous>, transform_indices = @transform_4, window_bounds = array<i64: 1, 32>}, {pipeline_mode = #tpu.pipeline_mode<synchronous>, transform_indices = @transform_5, window_bounds = array<i64: 1, 32>}, {pipeline_mode = #tpu.pipeline_mode<synchronous>, transform_indices = @transform_6, window_bounds = array<i64: 32, 32>}, {pipeline_mode = #tpu.pipeline_mode<synchronous>, transform_indices = @transform_7, window_bounds = array<i64: 32, 64>}, {pipeline_mode = #tpu.pipeline_mode<synchronous>, transform_indices = @transform_8, window_bounds = array<i64: 32, 32>}, {pipeline_mode = #tpu.pipeline_mode<synchronous>, transform_indices = @transform_9, window_bounds = array<i64: 1, 32>}, {transform_indices = @transform_10, window_bounds = array<i64: 1, 16, 32>}]} {
    %c0 = arith.constant 0 : index
    %c0_0 = arith.constant 0 : index
    %c0_1 = arith.constant 0 : index
    %0 = vector.load %arg1[%c0, %c0_0, %c0_1] : memref<1x8x32xbf16, #tpu.memory_space<vmem>>, vector<1x8x32xbf16>
    %1 = vector.shape_cast %0 : vector<1x8x32xbf16> to vector<8x32xbf16>
    %2 = arith.extf %1 : vector<8x32xbf16> to vector<8x32xf32>
    %c0_2 = arith.constant 0 : index
    %c0_3 = arith.constant 0 : index
    %c0_4 = arith.constant 0 : index
    %3 = vector.load %arg2[%c0_2, %c0_3, %c0_4] : memref<1x8x32xbf16, #tpu.memory_space<vmem>>, vector<1x8x32xbf16>
    %4 = vector.shape_cast %3 : vector<1x8x32xbf16> to vector<8x32xbf16>
    %5 = arith.extf %4 : vector<8x32xbf16> to vector<8x32xf32>
    %c0_5 = arith.constant 0 : index
    %c0_6 = arith.constant 0 : index
    %c0_7 = arith.constant 0 : index
    %6 = vector.load %arg3[%c0_5, %c0_6, %c0_7] : memref<1x8x32xbf16, #tpu.memory_space<vmem>>, vector<1x8x32xbf16>
    %7 = vector.shape_cast %6 : vector<1x8x32xbf16> to vector<8x32xbf16>
    %8 = arith.extf %7 : vector<8x32xbf16> to vector<8x32xf32>
    %c0_8 = arith.constant 0 : index
    %c0_9 = arith.constant 0 : index
    %c0_10 = arith.constant 0 : index
    %9 = vector.load %arg4[%c0_8, %c0_9, %c0_10] : memref<1x8x32xbf16, #tpu.memory_space<vmem>>, vector<1x8x32xbf16>
    %10 = vector.shape_cast %9 : vector<1x8x32xbf16> to vector<8x32xbf16>
    %11 = arith.extf %10 : vector<8x32xbf16> to vector<8x32xf32>
    %c0_11 = arith.constant 0 : index
    %c0_12 = arith.constant 0 : index
    %12 = vector.load %arg5[%c0_11, %c0_12] : memref<1x32xf32, #tpu.memory_space<vmem>>, vector<1x32xf32>
    %c0_13 = arith.constant 0 : index
    %c0_14 = arith.constant 0 : index
    %13 = vector.load %arg6[%c0_13, %c0_14] : memref<1x32xf32, #tpu.memory_space<vmem>>, vector<1x32xf32>
    %14 = tpu.concatenate %2, %5, %8, %11 in 0 : vector<8x32xf32>, vector<8x32xf32>, vector<8x32xf32>, vector<8x32xf32> -> vector<32x32xf32>
    %cst = arith.constant dense<0.000000e+00> : vector<32xf32>
    %15 = vector.multi_reduction <add>, %14, %cst [1] : vector<32x32xf32> to vector<32xf32>
    %16 = vector.shape_cast %15 : vector<32xf32> to vector<32x1xf32>
    %cst_15 = arith.constant 3.200000e+01 : f32
    %17 = vector.broadcast %cst_15 : f32 to vector<32x1xf32>
    %18 = arith.divf %16, %17 : vector<32x1xf32>
    %19 = vector.broadcast %18 : vector<32x1xf32> to vector<32x32xf32>
    %20 = arith.subf %14, %19 : vector<32x32xf32>
    %21 = arith.mulf %20, %20 : vector<32x32xf32>
    %cst_16 = arith.constant dense<0.000000e+00> : vector<32xf32>
    %22 = vector.multi_reduction <add>, %21, %cst_16 [1] : vector<32x32xf32> to vector<32xf32>
    %23 = vector.shape_cast %22 : vector<32xf32> to vector<32x1xf32>
    %cst_17 = arith.constant 3.200000e+01 : f32
    %24 = vector.broadcast %cst_17 : f32 to vector<32x1xf32>
    %25 = arith.divf %23, %24 : vector<32x1xf32>
    %cst_18 = arith.constant 9.99999974E-6 : f32
    %26 = vector.broadcast %cst_18 : f32 to vector<32x1xf32>
    %27 = arith.addf %25, %26 : vector<32x1xf32>
    %28 = math.rsqrt %27 : vector<32x1xf32>
    %29 = vector.broadcast %28 : vector<32x1xf32> to vector<32x32xf32>
    %30 = arith.mulf %20, %29 : vector<32x32xf32>
    %31 = vector.broadcast %12 : vector<1x32xf32> to vector<32x32xf32>
    %32 = arith.mulf %30, %31 : vector<32x32xf32>
    %33 = vector.broadcast %13 : vector<1x32xf32> to vector<32x32xf32>
    %34 = arith.addf %32, %33 : vector<32x32xf32>
    %35 = vector.extract_strided_slice %34 {offsets = [16, 0], sizes = [16, 32], strides = [1, 1]} : vector<32x32xf32> to vector<16x32xf32>
    %c0_19 = arith.constant 0 : index
    %c0_20 = arith.constant 0 : index
    %36 = vector.load %arg8[%c0_19, %c0_20] : memref<32x64xbf16, #tpu.memory_space<vmem>>, vector<32x64xbf16>
    %c0_21 = arith.constant 0 : index
    %c0_22 = arith.constant 0 : index
    %37 = vector.load %arg10[%c0_21, %c0_22] : memref<1x32xf32, #tpu.memory_space<vmem>>, vector<1x32xf32>
    %38 = vector.extract_strided_slice %34 {offsets = [0, 0], sizes = [16, 32], strides = [1, 1]} : vector<32x32xf32> to vector<16x32xf32>
    %c0_23 = arith.constant 0 : index
    %c0_24 = arith.constant 0 : index
    %39 = vector.load %arg7[%c0_23, %c0_24] : memref<32x32xbf16, #tpu.memory_space<vmem>>, vector<32x32xbf16>
    %40 = arith.truncf %38 : vector<16x32xf32> to vector<16x32xbf16>
    %cst_25 = arith.constant dense<0.000000e+00> : vector<16x32xf32>
    %41 = tpu.matmul %40, %39, %cst_25 {dimension_numbers = #tpu.dot_dimension_numbers<[1], [0], [0], [1], [0, 0, 1, 1], [], []>} : vector<16x32xbf16>, vector<32x32xbf16>, vector<16x32xf32> -> vector<16x32xf32>
    %42 = arith.truncf %35 : vector<16x32xf32> to vector<16x32xbf16>
    %cst_26 = arith.constant dense<0.000000e+00> : vector<16x64xf32>
    %43 = tpu.matmul %42, %36, %cst_26 {dimension_numbers = #tpu.dot_dimension_numbers<[1], [0], [0], [1], [0, 0, 1, 1], [], []>} : vector<16x32xbf16>, vector<32x64xbf16>, vector<16x64xf32> -> vector<16x64xf32>
    %44 = vector.extract_strided_slice %41 {offsets = [0, 0], sizes = [8, 32], strides = [1, 1]} : vector<16x32xf32> to vector<8x32xf32>
    %45 = vector.extract_strided_slice %43 {offsets = [0, 0], sizes = [16, 32], strides = [1, 1]} : vector<16x64xf32> to vector<16x32xf32>
    %46 = tpu.transpose %45, [1, 0] : vector<16x32xf32> -> vector<32x16xf32>
    %47 = arith.truncf %46 : vector<32x16xf32> to vector<32x16xbf16>
    %48 = vector.extract_strided_slice %43 {offsets = [0, 32], sizes = [16, 32], strides = [1, 1]} : vector<16x64xf32> to vector<16x32xf32>
    %49 = arith.truncf %48 : vector<16x32xf32> to vector<16x32xbf16>
    %cst_27 = arith.constant 0.353553385 : f32
    %50 = vector.broadcast %cst_27 : f32 to vector<8x32xf32>
    %51 = arith.mulf %44, %50 : vector<8x32xf32>
    %52 = arith.truncf %51 : vector<8x32xf32> to vector<8x32xbf16>
    %53 = vector.extract_strided_slice %52 {offsets = [0, 0], sizes = [8, 8], strides = [1, 1]} : vector<8x32xbf16> to vector<8x8xbf16>
    %54 = vector.extract_strided_slice %47 {offsets = [0, 0], sizes = [8, 16], strides = [1, 1]} : vector<32x16xbf16> to vector<8x16xbf16>
    %cst_28 = arith.constant dense<0.000000e+00> : vector<8x16xf32>
    %55 = tpu.matmul %53, %54, %cst_28 {dimension_numbers = #tpu.dot_dimension_numbers<[1], [0], [0], [1], [0, 0, 1, 1], [], []>} : vector<8x8xbf16>, vector<8x16xbf16>, vector<8x16xf32> -> vector<8x16xf32>
    %cst_29 = arith.constant dense<0xFF800000> : vector<8xf32>
    %56 = vector.multi_reduction <maximumf>, %55, %cst_29 [1] : vector<8x16xf32> to vector<8xf32>
    %57 = vector.shape_cast %56 : vector<8xf32> to vector<8x1xf32>
    %58 = vector.broadcast %57 : vector<8x1xf32> to vector<8x16xf32>
    %59 = arith.subf %55, %58 : vector<8x16xf32>
    %60 = math.exp %59 : vector<8x16xf32>
    %cst_30 = arith.constant dense<0.000000e+00> : vector<8xf32>
    %61 = vector.multi_reduction <add>, %60, %cst_30 [1] : vector<8x16xf32> to vector<8xf32>
    %62 = vector.shape_cast %61 : vector<8xf32> to vector<8x1xf32>
    %63 = tpu.reciprocal %62 {approx = true} : vector<8x1xf32> -> vector<8x1xf32>
    %64 = vector.broadcast %63 : vector<8x1xf32> to vector<8x16xf32>
    %65 = arith.mulf %60, %64 : vector<8x16xf32>
    %66 = arith.truncf %65 : vector<8x16xf32> to vector<8x16xbf16>
    %67 = vector.extract_strided_slice %49 {offsets = [0, 0], sizes = [16, 8], strides = [1, 1]} : vector<16x32xbf16> to vector<16x8xbf16>
    %cst_31 = arith.constant dense<0.000000e+00> : vector<8x8xf32>
    %68 = tpu.matmul %66, %67, %cst_31 {dimension_numbers = #tpu.dot_dimension_numbers<[1], [0], [0], [1], [0, 0, 1, 1], [], []>} : vector<8x16xbf16>, vector<16x8xbf16>, vector<8x8xf32> -> vector<8x8xf32>
    %69 = arith.truncf %68 : vector<8x8xf32> to vector<8x8xbf16>
    %c0_32 = arith.constant 0 : index
    %c0_33 = arith.constant 0 : index
    %70 = vector.load %arg9[%c0_32, %c0_33] : memref<32x32xbf16, #tpu.memory_space<vmem>>, vector<8x32xbf16>
    %cst_34 = arith.constant dense<0.000000e+00> : vector<8x32xf32>
    %71 = tpu.matmul %69, %70, %cst_34 {dimension_numbers = #tpu.dot_dimension_numbers<[1], [0], [0], [1], [0, 0, 1, 1], [], []>} : vector<8x8xbf16>, vector<8x32xbf16>, vector<8x32xf32> -> vector<8x32xf32>
    %72 = vector.extract_strided_slice %52 {offsets = [0, 8], sizes = [8, 8], strides = [1, 1]} : vector<8x32xbf16> to vector<8x8xbf16>
    %73 = vector.extract_strided_slice %47 {offsets = [8, 0], sizes = [8, 16], strides = [1, 1]} : vector<32x16xbf16> to vector<8x16xbf16>
    %cst_35 = arith.constant dense<0.000000e+00> : vector<8x16xf32>
    %74 = tpu.matmul %72, %73, %cst_35 {dimension_numbers = #tpu.dot_dimension_numbers<[1], [0], [0], [1], [0, 0, 1, 1], [], []>} : vector<8x8xbf16>, vector<8x16xbf16>, vector<8x16xf32> -> vector<8x16xf32>
    %cst_36 = arith.constant dense<0xFF800000> : vector<8xf32>
    %75 = vector.multi_reduction <maximumf>, %74, %cst_36 [1] : vector<8x16xf32> to vector<8xf32>
    %76 = vector.shape_cast %75 : vector<8xf32> to vector<8x1xf32>
    %77 = vector.broadcast %76 : vector<8x1xf32> to vector<8x16xf32>
    %78 = arith.subf %74, %77 : vector<8x16xf32>
    %79 = math.exp %78 : vector<8x16xf32>
    %cst_37 = arith.constant dense<0.000000e+00> : vector<8xf32>
    %80 = vector.multi_reduction <add>, %79, %cst_37 [1] : vector<8x16xf32> to vector<8xf32>
    %81 = vector.shape_cast %80 : vector<8xf32> to vector<8x1xf32>
    %82 = tpu.reciprocal %81 {approx = true} : vector<8x1xf32> -> vector<8x1xf32>
    %83 = vector.broadcast %82 : vector<8x1xf32> to vector<8x16xf32>
    %84 = arith.mulf %79, %83 : vector<8x16xf32>
    %85 = arith.truncf %84 : vector<8x16xf32> to vector<8x16xbf16>
    %86 = vector.extract_strided_slice %49 {offsets = [0, 8], sizes = [16, 8], strides = [1, 1]} : vector<16x32xbf16> to vector<16x8xbf16>
    %cst_38 = arith.constant dense<0.000000e+00> : vector<8x8xf32>
    %87 = tpu.matmul %85, %86, %cst_38 {dimension_numbers = #tpu.dot_dimension_numbers<[1], [0], [0], [1], [0, 0, 1, 1], [], []>} : vector<8x16xbf16>, vector<16x8xbf16>, vector<8x8xf32> -> vector<8x8xf32>
    %88 = arith.truncf %87 : vector<8x8xf32> to vector<8x8xbf16>
    %c8 = arith.constant 8 : index
    %c0_39 = arith.constant 0 : index
    %89 = vector.load %arg9[%c8, %c0_39] : memref<32x32xbf16, #tpu.memory_space<vmem>>, vector<8x32xbf16>
    %cst_40 = arith.constant dense<0.000000e+00> : vector<8x32xf32>
    %90 = tpu.matmul %88, %89, %cst_40 {dimension_numbers = #tpu.dot_dimension_numbers<[1], [0], [0], [1], [0, 0, 1, 1], [], []>} : vector<8x8xbf16>, vector<8x32xbf16>, vector<8x32xf32> -> vector<8x32xf32>
    %91 = arith.addf %71, %90 : vector<8x32xf32>
    %92 = vector.extract_strided_slice %52 {offsets = [0, 16], sizes = [8, 8], strides = [1, 1]} : vector<8x32xbf16> to vector<8x8xbf16>
    %93 = vector.extract_strided_slice %47 {offsets = [16, 0], sizes = [8, 16], strides = [1, 1]} : vector<32x16xbf16> to vector<8x16xbf16>
    %cst_41 = arith.constant dense<0.000000e+00> : vector<8x16xf32>
    %94 = tpu.matmul %92, %93, %cst_41 {dimension_numbers = #tpu.dot_dimension_numbers<[1], [0], [0], [1], [0, 0, 1, 1], [], []>} : vector<8x8xbf16>, vector<8x16xbf16>, vector<8x16xf32> -> vector<8x16xf32>
    %cst_42 = arith.constant dense<0xFF800000> : vector<8xf32>
    %95 = vector.multi_reduction <maximumf>, %94, %cst_42 [1] : vector<8x16xf32> to vector<8xf32>
    %96 = vector.shape_cast %95 : vector<8xf32> to vector<8x1xf32>
    %97 = vector.broadcast %96 : vector<8x1xf32> to vector<8x16xf32>
    %98 = arith.subf %94, %97 : vector<8x16xf32>
    %99 = math.exp %98 : vector<8x16xf32>
    %cst_43 = arith.constant dense<0.000000e+00> : vector<8xf32>
    %100 = vector.multi_reduction <add>, %99, %cst_43 [1] : vector<8x16xf32> to vector<8xf32>
    %101 = vector.shape_cast %100 : vector<8xf32> to vector<8x1xf32>
    %102 = tpu.reciprocal %101 {approx = true} : vector<8x1xf32> -> vector<8x1xf32>
    %103 = vector.broadcast %102 : vector<8x1xf32> to vector<8x16xf32>
    %104 = arith.mulf %99, %103 : vector<8x16xf32>
    %105 = arith.truncf %104 : vector<8x16xf32> to vector<8x16xbf16>
    %106 = vector.extract_strided_slice %49 {offsets = [0, 16], sizes = [16, 8], strides = [1, 1]} : vector<16x32xbf16> to vector<16x8xbf16>
    %cst_44 = arith.constant dense<0.000000e+00> : vector<8x8xf32>
    %107 = tpu.matmul %105, %106, %cst_44 {dimension_numbers = #tpu.dot_dimension_numbers<[1], [0], [0], [1], [0, 0, 1, 1], [], []>} : vector<8x16xbf16>, vector<16x8xbf16>, vector<8x8xf32> -> vector<8x8xf32>
    %108 = arith.truncf %107 : vector<8x8xf32> to vector<8x8xbf16>
    %c16 = arith.constant 16 : index
    %c0_45 = arith.constant 0 : index
    %109 = vector.load %arg9[%c16, %c0_45] : memref<32x32xbf16, #tpu.memory_space<vmem>>, vector<8x32xbf16>
    %cst_46 = arith.constant dense<0.000000e+00> : vector<8x32xf32>
    %110 = tpu.matmul %108, %109, %cst_46 {dimension_numbers = #tpu.dot_dimension_numbers<[1], [0], [0], [1], [0, 0, 1, 1], [], []>} : vector<8x8xbf16>, vector<8x32xbf16>, vector<8x32xf32> -> vector<8x32xf32>
    %111 = arith.addf %91, %110 : vector<8x32xf32>
    %112 = vector.extract_strided_slice %52 {offsets = [0, 24], sizes = [8, 8], strides = [1, 1]} : vector<8x32xbf16> to vector<8x8xbf16>
    %113 = vector.extract_strided_slice %47 {offsets = [24, 0], sizes = [8, 16], strides = [1, 1]} : vector<32x16xbf16> to vector<8x16xbf16>
    %cst_47 = arith.constant dense<0.000000e+00> : vector<8x16xf32>
    %114 = tpu.matmul %112, %113, %cst_47 {dimension_numbers = #tpu.dot_dimension_numbers<[1], [0], [0], [1], [0, 0, 1, 1], [], []>} : vector<8x8xbf16>, vector<8x16xbf16>, vector<8x16xf32> -> vector<8x16xf32>
    %cst_48 = arith.constant dense<0xFF800000> : vector<8xf32>
    %115 = vector.multi_reduction <maximumf>, %114, %cst_48 [1] : vector<8x16xf32> to vector<8xf32>
    %116 = vector.shape_cast %115 : vector<8xf32> to vector<8x1xf32>
    %117 = vector.broadcast %116 : vector<8x1xf32> to vector<8x16xf32>
    %118 = arith.subf %114, %117 : vector<8x16xf32>
    %119 = math.exp %118 : vector<8x16xf32>
    %cst_49 = arith.constant dense<0.000000e+00> : vector<8xf32>
    %120 = vector.multi_reduction <add>, %119, %cst_49 [1] : vector<8x16xf32> to vector<8xf32>
    %121 = vector.shape_cast %120 : vector<8xf32> to vector<8x1xf32>
    %122 = tpu.reciprocal %121 {approx = true} : vector<8x1xf32> -> vector<8x1xf32>
    %123 = vector.broadcast %122 : vector<8x1xf32> to vector<8x16xf32>
    %124 = arith.mulf %119, %123 : vector<8x16xf32>
    %125 = arith.truncf %124 : vector<8x16xf32> to vector<8x16xbf16>
    %126 = vector.extract_strided_slice %49 {offsets = [0, 24], sizes = [16, 8], strides = [1, 1]} : vector<16x32xbf16> to vector<16x8xbf16>
    %cst_50 = arith.constant dense<0.000000e+00> : vector<8x8xf32>
    %127 = tpu.matmul %125, %126, %cst_50 {dimension_numbers = #tpu.dot_dimension_numbers<[1], [0], [0], [1], [0, 0, 1, 1], [], []>} : vector<8x16xbf16>, vector<16x8xbf16>, vector<8x8xf32> -> vector<8x8xf32>
    %128 = arith.truncf %127 : vector<8x8xf32> to vector<8x8xbf16>
    %c24 = arith.constant 24 : index
    %c0_51 = arith.constant 0 : index
    %129 = vector.load %arg9[%c24, %c0_51] : memref<32x32xbf16, #tpu.memory_space<vmem>>, vector<8x32xbf16>
    %cst_52 = arith.constant dense<0.000000e+00> : vector<8x32xf32>
    %130 = tpu.matmul %128, %129, %cst_52 {dimension_numbers = #tpu.dot_dimension_numbers<[1], [0], [0], [1], [0, 0, 1, 1], [], []>} : vector<8x8xbf16>, vector<8x32xbf16>, vector<8x32xf32> -> vector<8x32xf32>
    %131 = arith.addf %111, %130 : vector<8x32xf32>
    %132 = vector.broadcast %37 : vector<1x32xf32> to vector<8x32xf32>
    %133 = arith.addf %131, %132 : vector<8x32xf32>
    %134 = arith.truncf %133 : vector<8x32xf32> to vector<8x32xbf16>
    %cst_53 = arith.constant dense<0.000000e+00> : vector<8x64xf32>
    %135 = tpu.matmul %134, %36, %cst_53 {dimension_numbers = #tpu.dot_dimension_numbers<[1], [0], [0], [1], [0, 0, 1, 1], [], []>} : vector<8x32xbf16>, vector<32x64xbf16>, vector<8x64xf32> -> vector<8x64xf32>
    %136 = vector.extract_strided_slice %41 {offsets = [8, 0], sizes = [8, 32], strides = [1, 1]} : vector<16x32xf32> to vector<8x32xf32>
    %137 = vector.extract_strided_slice %135 {offsets = [0, 0], sizes = [8, 32], strides = [1, 1]} : vector<8x64xf32> to vector<8x32xf32>
    %138 = tpu.transpose %137, [1, 0] : vector<8x32xf32> -> vector<32x8xf32>
    %139 = arith.truncf %138 : vector<32x8xf32> to vector<32x8xbf16>
    %140 = vector.extract_strided_slice %135 {offsets = [0, 32], sizes = [8, 32], strides = [1, 1]} : vector<8x64xf32> to vector<8x32xf32>
    %141 = arith.truncf %140 : vector<8x32xf32> to vector<8x32xbf16>
    %cst_54 = arith.constant 0.353553385 : f32
    %142 = vector.broadcast %cst_54 : f32 to vector<8x32xf32>
    %143 = arith.mulf %136, %142 : vector<8x32xf32>
    %144 = arith.truncf %143 : vector<8x32xf32> to vector<8x32xbf16>
    %145 = vector.extract_strided_slice %144 {offsets = [0, 0], sizes = [8, 8], strides = [1, 1]} : vector<8x32xbf16> to vector<8x8xbf16>
    %146 = vector.extract_strided_slice %139 {offsets = [0, 0], sizes = [8, 8], strides = [1, 1]} : vector<32x8xbf16> to vector<8x8xbf16>
    %cst_55 = arith.constant dense<0.000000e+00> : vector<8x8xf32>
    %147 = tpu.matmul %145, %146, %cst_55 {dimension_numbers = #tpu.dot_dimension_numbers<[1], [0], [0], [1], [0, 0, 1, 1], [], []>} : vector<8x8xbf16>, vector<8x8xbf16>, vector<8x8xf32> -> vector<8x8xf32>
    %cst_56 = arith.constant dense<0xFF800000> : vector<8xf32>
    %148 = vector.multi_reduction <maximumf>, %147, %cst_56 [1] : vector<8x8xf32> to vector<8xf32>
    %149 = vector.shape_cast %148 : vector<8xf32> to vector<8x1xf32>
    %150 = vector.broadcast %149 : vector<8x1xf32> to vector<8x8xf32>
    %151 = arith.subf %147, %150 : vector<8x8xf32>
    %152 = math.exp %151 : vector<8x8xf32>
    %cst_57 = arith.constant dense<0.000000e+00> : vector<8xf32>
    %153 = vector.multi_reduction <add>, %152, %cst_57 [1] : vector<8x8xf32> to vector<8xf32>
    %154 = vector.shape_cast %153 : vector<8xf32> to vector<8x1xf32>
    %155 = tpu.reciprocal %154 {approx = true} : vector<8x1xf32> -> vector<8x1xf32>
    %156 = vector.broadcast %155 : vector<8x1xf32> to vector<8x8xf32>
    %157 = arith.mulf %152, %156 : vector<8x8xf32>
    %158 = arith.truncf %157 : vector<8x8xf32> to vector<8x8xbf16>
    %159 = vector.extract_strided_slice %141 {offsets = [0, 0], sizes = [8, 8], strides = [1, 1]} : vector<8x32xbf16> to vector<8x8xbf16>
    %cst_58 = arith.constant dense<0.000000e+00> : vector<8x8xf32>
    %160 = tpu.matmul %158, %159, %cst_58 {dimension_numbers = #tpu.dot_dimension_numbers<[1], [0], [0], [1], [0, 0, 1, 1], [], []>} : vector<8x8xbf16>, vector<8x8xbf16>, vector<8x8xf32> -> vector<8x8xf32>
    %161 = arith.truncf %160 : vector<8x8xf32> to vector<8x8xbf16>
    %c0_59 = arith.constant 0 : index
    %c0_60 = arith.constant 0 : index
    %162 = vector.load %arg9[%c0_59, %c0_60] : memref<32x32xbf16, #tpu.memory_space<vmem>>, vector<8x32xbf16>
    %cst_61 = arith.constant dense<0.000000e+00> : vector<8x32xf32>
    %163 = tpu.matmul %161, %162, %cst_61 {dimension_numbers = #tpu.dot_dimension_numbers<[1], [0], [0], [1], [0, 0, 1, 1], [], []>} : vector<8x8xbf16>, vector<8x32xbf16>, vector<8x32xf32> -> vector<8x32xf32>
    %164 = vector.extract_strided_slice %144 {offsets = [0, 8], sizes = [8, 8], strides = [1, 1]} : vector<8x32xbf16> to vector<8x8xbf16>
    %165 = vector.extract_strided_slice %139 {offsets = [8, 0], sizes = [8, 8], strides = [1, 1]} : vector<32x8xbf16> to vector<8x8xbf16>
    %cst_62 = arith.constant dense<0.000000e+00> : vector<8x8xf32>
    %166 = tpu.matmul %164, %165, %cst_62 {dimension_numbers = #tpu.dot_dimension_numbers<[1], [0], [0], [1], [0, 0, 1, 1], [], []>} : vector<8x8xbf16>, vector<8x8xbf16>, vector<8x8xf32> -> vector<8x8xf32>
    %cst_63 = arith.constant dense<0xFF800000> : vector<8xf32>
    %167 = vector.multi_reduction <maximumf>, %166, %cst_63 [1] : vector<8x8xf32> to vector<8xf32>
    %168 = vector.shape_cast %167 : vector<8xf32> to vector<8x1xf32>
    %169 = vector.broadcast %168 : vector<8x1xf32> to vector<8x8xf32>
    %170 = arith.subf %166, %169 : vector<8x8xf32>
    %171 = math.exp %170 : vector<8x8xf32>
    %cst_64 = arith.constant dense<0.000000e+00> : vector<8xf32>
    %172 = vector.multi_reduction <add>, %171, %cst_64 [1] : vector<8x8xf32> to vector<8xf32>
    %173 = vector.shape_cast %172 : vector<8xf32> to vector<8x1xf32>
    %174 = tpu.reciprocal %173 {approx = true} : vector<8x1xf32> -> vector<8x1xf32>
    %175 = vector.broadcast %174 : vector<8x1xf32> to vector<8x8xf32>
    %176 = arith.mulf %171, %175 : vector<8x8xf32>
    %177 = arith.truncf %176 : vector<8x8xf32> to vector<8x8xbf16>
    %178 = vector.extract_strided_slice %141 {offsets = [0, 8], sizes = [8, 8], strides = [1, 1]} : vector<8x32xbf16> to vector<8x8xbf16>
    %cst_65 = arith.constant dense<0.000000e+00> : vector<8x8xf32>
    %179 = tpu.matmul %177, %178, %cst_65 {dimension_numbers = #tpu.dot_dimension_numbers<[1], [0], [0], [1], [0, 0, 1, 1], [], []>} : vector<8x8xbf16>, vector<8x8xbf16>, vector<8x8xf32> -> vector<8x8xf32>
    %180 = arith.truncf %179 : vector<8x8xf32> to vector<8x8xbf16>
    %c8_66 = arith.constant 8 : index
    %c0_67 = arith.constant 0 : index
    %181 = vector.load %arg9[%c8_66, %c0_67] : memref<32x32xbf16, #tpu.memory_space<vmem>>, vector<8x32xbf16>
    %cst_68 = arith.constant dense<0.000000e+00> : vector<8x32xf32>
    %182 = tpu.matmul %180, %181, %cst_68 {dimension_numbers = #tpu.dot_dimension_numbers<[1], [0], [0], [1], [0, 0, 1, 1], [], []>} : vector<8x8xbf16>, vector<8x32xbf16>, vector<8x32xf32> -> vector<8x32xf32>
    %183 = arith.addf %163, %182 : vector<8x32xf32>
    %184 = vector.extract_strided_slice %144 {offsets = [0, 16], sizes = [8, 8], strides = [1, 1]} : vector<8x32xbf16> to vector<8x8xbf16>
    %185 = vector.extract_strided_slice %139 {offsets = [16, 0], sizes = [8, 8], strides = [1, 1]} : vector<32x8xbf16> to vector<8x8xbf16>
    %cst_69 = arith.constant dense<0.000000e+00> : vector<8x8xf32>
    %186 = tpu.matmul %184, %185, %cst_69 {dimension_numbers = #tpu.dot_dimension_numbers<[1], [0], [0], [1], [0, 0, 1, 1], [], []>} : vector<8x8xbf16>, vector<8x8xbf16>, vector<8x8xf32> -> vector<8x8xf32>
    %cst_70 = arith.constant dense<0xFF800000> : vector<8xf32>
    %187 = vector.multi_reduction <maximumf>, %186, %cst_70 [1] : vector<8x8xf32> to vector<8xf32>
    %188 = vector.shape_cast %187 : vector<8xf32> to vector<8x1xf32>
    %189 = vector.broadcast %188 : vector<8x1xf32> to vector<8x8xf32>
    %190 = arith.subf %186, %189 : vector<8x8xf32>
    %191 = math.exp %190 : vector<8x8xf32>
    %cst_71 = arith.constant dense<0.000000e+00> : vector<8xf32>
    %192 = vector.multi_reduction <add>, %191, %cst_71 [1] : vector<8x8xf32> to vector<8xf32>
    %193 = vector.shape_cast %192 : vector<8xf32> to vector<8x1xf32>
    %194 = tpu.reciprocal %193 {approx = true} : vector<8x1xf32> -> vector<8x1xf32>
    %195 = vector.broadcast %194 : vector<8x1xf32> to vector<8x8xf32>
    %196 = arith.mulf %191, %195 : vector<8x8xf32>
    %197 = arith.truncf %196 : vector<8x8xf32> to vector<8x8xbf16>
    %198 = vector.extract_strided_slice %141 {offsets = [0, 16], sizes = [8, 8], strides = [1, 1]} : vector<8x32xbf16> to vector<8x8xbf16>
    %cst_72 = arith.constant dense<0.000000e+00> : vector<8x8xf32>
    %199 = tpu.matmul %197, %198, %cst_72 {dimension_numbers = #tpu.dot_dimension_numbers<[1], [0], [0], [1], [0, 0, 1, 1], [], []>} : vector<8x8xbf16>, vector<8x8xbf16>, vector<8x8xf32> -> vector<8x8xf32>
    %200 = arith.truncf %199 : vector<8x8xf32> to vector<8x8xbf16>
    %c16_73 = arith.constant 16 : index
    %c0_74 = arith.constant 0 : index
    %201 = vector.load %arg9[%c16_73, %c0_74] : memref<32x32xbf16, #tpu.memory_space<vmem>>, vector<8x32xbf16>
    %cst_75 = arith.constant dense<0.000000e+00> : vector<8x32xf32>
    %202 = tpu.matmul %200, %201, %cst_75 {dimension_numbers = #tpu.dot_dimension_numbers<[1], [0], [0], [1], [0, 0, 1, 1], [], []>} : vector<8x8xbf16>, vector<8x32xbf16>, vector<8x32xf32> -> vector<8x32xf32>
    %203 = arith.addf %183, %202 : vector<8x32xf32>
    %204 = vector.extract_strided_slice %144 {offsets = [0, 24], sizes = [8, 8], strides = [1, 1]} : vector<8x32xbf16> to vector<8x8xbf16>
    %205 = vector.extract_strided_slice %139 {offsets = [24, 0], sizes = [8, 8], strides = [1, 1]} : vector<32x8xbf16> to vector<8x8xbf16>
    %cst_76 = arith.constant dense<0.000000e+00> : vector<8x8xf32>
    %206 = tpu.matmul %204, %205, %cst_76 {dimension_numbers = #tpu.dot_dimension_numbers<[1], [0], [0], [1], [0, 0, 1, 1], [], []>} : vector<8x8xbf16>, vector<8x8xbf16>, vector<8x8xf32> -> vector<8x8xf32>
    %cst_77 = arith.constant dense<0xFF800000> : vector<8xf32>
    %207 = vector.multi_reduction <maximumf>, %206, %cst_77 [1] : vector<8x8xf32> to vector<8xf32>
    %208 = vector.shape_cast %207 : vector<8xf32> to vector<8x1xf32>
    %209 = vector.broadcast %208 : vector<8x1xf32> to vector<8x8xf32>
    %210 = arith.subf %206, %209 : vector<8x8xf32>
    %211 = math.exp %210 : vector<8x8xf32>
    %cst_78 = arith.constant dense<0.000000e+00> : vector<8xf32>
    %212 = vector.multi_reduction <add>, %211, %cst_78 [1] : vector<8x8xf32> to vector<8xf32>
    %213 = vector.shape_cast %212 : vector<8xf32> to vector<8x1xf32>
    %214 = tpu.reciprocal %213 {approx = true} : vector<8x1xf32> -> vector<8x1xf32>
    %215 = vector.broadcast %214 : vector<8x1xf32> to vector<8x8xf32>
    %216 = arith.mulf %211, %215 : vector<8x8xf32>
    %217 = arith.truncf %216 : vector<8x8xf32> to vector<8x8xbf16>
    %218 = vector.extract_strided_slice %141 {offsets = [0, 24], sizes = [8, 8], strides = [1, 1]} : vector<8x32xbf16> to vector<8x8xbf16>
    %cst_79 = arith.constant dense<0.000000e+00> : vector<8x8xf32>
    %219 = tpu.matmul %217, %218, %cst_79 {dimension_numbers = #tpu.dot_dimension_numbers<[1], [0], [0], [1], [0, 0, 1, 1], [], []>} : vector<8x8xbf16>, vector<8x8xbf16>, vector<8x8xf32> -> vector<8x8xf32>
    %220 = arith.truncf %219 : vector<8x8xf32> to vector<8x8xbf16>
    %c24_80 = arith.constant 24 : index
    %c0_81 = arith.constant 0 : index
    %221 = vector.load %arg9[%c24_80, %c0_81] : memref<32x32xbf16, #tpu.memory_space<vmem>>, vector<8x32xbf16>
    %cst_82 = arith.constant dense<0.000000e+00> : vector<8x32xf32>
    %222 = tpu.matmul %220, %221, %cst_82 {dimension_numbers = #tpu.dot_dimension_numbers<[1], [0], [0], [1], [0, 0, 1, 1], [], []>} : vector<8x8xbf16>, vector<8x32xbf16>, vector<8x32xf32> -> vector<8x32xf32>
    %223 = arith.addf %203, %222 : vector<8x32xf32>
    %224 = vector.broadcast %37 : vector<1x32xf32> to vector<8x32xf32>
    %225 = arith.addf %223, %224 : vector<8x32xf32>
    %cst_83 = arith.constant 1.000000e+00 : f32
    %226 = vector.broadcast %cst_83 : f32 to vector<8x32xf32>
    %227 = arith.mulf %226, %133 : vector<8x32xf32>
    %228 = arith.addf %2, %227 : vector<8x32xf32>
    %229 = arith.truncf %228 : vector<8x32xf32> to vector<8x32xbf16>
    %c0_84 = arith.constant 0 : index
    %c0_85 = arith.constant 0 : index
    %c0_86 = arith.constant 0 : index
    %230 = vector.load %arg11[%c0_84, %c0_85, %c0_86] : memref<1x16x32xbf16, #tpu.memory_space<vmem>>, vector<1x8x32xbf16>
    %231 = vector.shape_cast %230 : vector<1x8x32xbf16> to vector<8x32xbf16>
    %232 = vector.shape_cast %229 : vector<8x32xbf16> to vector<1x8x32xbf16>
    tpu.vector_store %arg11[%c0_84, %c0_85, %c0_86], %232 {strides = array<i32>} : memref<1x16x32xbf16, #tpu.memory_space<vmem>>, vector<1x8x32xbf16>,
    %cst_87 = arith.constant 1.000000e+00 : f32
    %233 = vector.broadcast %cst_87 : f32 to vector<8x32xf32>
    %234 = arith.mulf %233, %225 : vector<8x32xf32>
    %235 = arith.addf %5, %234 : vector<8x32xf32>
    %236 = arith.truncf %235 : vector<8x32xf32> to vector<8x32xbf16>
    %c0_88 = arith.constant 0 : index
    %c8_89 = arith.constant 8 : index
    %c0_90 = arith.constant 0 : index
    %237 = vector.load %arg11[%c0_88, %c8_89, %c0_90] : memref<1x16x32xbf16, #tpu.memory_space<vmem>>, vector<1x8x32xbf16>
    %238 = vector.shape_cast %237 : vector<1x8x32xbf16> to vector<8x32xbf16>
    %239 = vector.shape_cast %236 : vector<8x32xbf16> to vector<1x8x32xbf16>
    tpu.vector_store %arg11[%c0_88, %c8_89, %c0_90], %239 {strides = array<i32>} : memref<1x16x32xbf16, #tpu.memory_space<vmem>>, vector<1x8x32xbf16>,
    return
  }
  func.func @transform_0(%arg0: i32) -> (i32, i32, i32) {
    %c0_i32 = arith.constant 0 : i32
    %c0_i32_0 = arith.constant 0 : i32
    %c0_i32_1 = arith.constant 0 : i32
    return %arg0, %c0_i32, %c0_i32_0 : i32, i32, i32
  }
  func.func @transform_1(%arg0: i32) -> (i32, i32, i32) {
    %c0_i32 = arith.constant 0 : i32
    %c0_i32_0 = arith.constant 0 : i32
    %c0_i32_1 = arith.constant 0 : i32
    return %arg0, %c0_i32, %c0_i32_0 : i32, i32, i32
  }
  func.func @transform_2(%arg0: i32) -> (i32, i32, i32) {
    %c0_i32 = arith.constant 0 : i32
    %c0_i32_0 = arith.constant 0 : i32
    %c0_i32_1 = arith.constant 0 : i32
    return %arg0, %c0_i32, %c0_i32_0 : i32, i32, i32
  }
  func.func @transform_3(%arg0: i32) -> (i32, i32, i32) {
    %c0_i32 = arith.constant 0 : i32
    %c0_i32_0 = arith.constant 0 : i32
    %c0_i32_1 = arith.constant 0 : i32
    return %arg0, %c0_i32, %c0_i32_0 : i32, i32, i32
  }
  func.func @transform_4(%arg0: i32) -> (i32, i32) {
    %c0_i32 = arith.constant 0 : i32
    %c0_i32_0 = arith.constant 0 : i32
    %c0_i32_1 = arith.constant 0 : i32
    return %c0_i32, %c0_i32_0 : i32, i32
  }
  func.func @transform_5(%arg0: i32) -> (i32, i32) {
    %c0_i32 = arith.constant 0 : i32
    %c0_i32_0 = arith.constant 0 : i32
    %c0_i32_1 = arith.constant 0 : i32
    return %c0_i32, %c0_i32_0 : i32, i32
  }
  func.func @transform_6(%arg0: i32) -> (i32, i32) {
    %c0_i32 = arith.constant 0 : i32
    %c0_i32_0 = arith.constant 0 : i32
    %c0_i32_1 = arith.constant 0 : i32
    return %c0_i32, %c0_i32_0 : i32, i32
  }
  func.func @transform_7(%arg0: i32) -> (i32, i32) {
    %c0_i32 = arith.constant 0 : i32
    %c0_i32_0 = arith.constant 0 : i32
    %c0_i32_1 = arith.constant 0 : i32
    return %c0_i32, %c0_i32_0 : i32, i32
  }
  func.func @transform_8(%arg0: i32) -> (i32, i32) {
    %c0_i32 = arith.constant 0 : i32
    %c0_i32_0 = arith.constant 0 : i32
    %c0_i32_1 = arith.constant 0 : i32
    return %c0_i32, %c0_i32_0 : i32, i32
  }
  func.func @transform_9(%arg0: i32) -> (i32, i32) {
    %c0_i32 = arith.constant 0 : i32
    %c0_i32_0 = arith.constant 0 : i32
    %c0_i32_1 = arith.constant 0 : i32
    return %c0_i32, %c0_i32_0 : i32, i32
  }
  func.func @transform_10(%arg0: i32) -> (i32, i32, i32) {
    %c0_i32 = arith.constant 0 : i32
    %c0_i32_0 = arith.constant 0 : i32
    %c0_i32_1 = arith.constant 0 : i32
    return %arg0, %c0_i32, %c0_i32_0 : i32, i32, i32
  }
}

</mosaic_0001>

<bundles_post_ra>
// kernel: tpu_custom_call.1
= control target key start
LH: loop header
LB: loop body
LE: loop exit
PB: predicated region body
PF: predicated region fallthrough
CT: control target
= control target key end

     0   :  { %s3979_s0 = inlined_call_operand.hbm [shape: bf16[2,8,32], index: 0, kind: input, shape index: {}]   ;;  %s3980_s1 = inlined_call_operand.hbm [shape: bf16[2,8,32], index: 1, kind: input, shape index: {}]   ;;  %s3981_s2 = inlined_call_operand.hbm [shape: bf16[2,8,32], index: 2, kind: input, shape index: {}]   ;;  %s3982_s3 = inlined_call_operand.hbm [shape: bf16[2,8,32], index: 3, kind: input, shape index: {}]   ;;  %s3983_s4 = inlined_call_operand.hbm [shape: f32[1,32], index: 4, kind: input, shape index: {}]   ;;  %s3984_s5 = inlined_call_operand.hbm [shape: f32[1,32], index: 5, kind: input, shape index: {}]   ;;  %s3985_s6 = inlined_call_operand.hbm [shape: bf16[32,32], index: 6, kind: input, shape index: {}]   ;;  %s3986_s7 = inlined_call_operand.hbm [shape: bf16[32,64], index: 7, kind: input, shape index: {}]   ;;  %s3987_s8 = inlined_call_operand.hbm [shape: bf16[32,32], index: 8, kind: input, shape index: {}]   ;;  %s3988_s9 = inlined_call_operand.hbm [shape: f32[1,32], index: 9, kind: input, shape index: {}]   ;;  %s3989_s10 = inlined_call_operand.hbm [shape: bf16[2,16,32], index: 10, kind: output, shape index: {}]  }
   0x1   :  { %4019 = sst [smem:[#allocation35_spill]] %s3980_s1 }
   0x2   :  { %4020 = sst [smem:[#allocation36_spill]] %s3983_s4 }
   0x3   :  { %4021 = sst [smem:[#allocation37_spill]] %s3984_s5 }
   0x4   :  { %4022 = sst [smem:[#allocation38_spill]] %s3985_s6 }
   0x5   :  { %4023 = sst [smem:[#allocation39_spill]] %s3986_s7 }
   0x6   :  { %4024 = sst [smem:[#allocation40_spill]] %s3989_s10 }
   0x7   :  { %15 = vsyncpa [#allocation3], 0 }
   0x8   :  { %17 = vsyncpa [#allocation3 + $0x1], 0 }
   0x9   :  { %18 = vsyncpa [#allocation6], 0 }
   0xa   :  { %20 = vsyncpa [#allocation6 + $0x1], 0 }
   0xb   :  { %21 = vsyncpa [#allocation9], 0 }
   0xc   :  { %23 = vsyncpa [#allocation9 + $0x1], 0 }
   0xd   :  { %24 = vsyncpa [#allocation12], 0 }
   0xe   :  { %25 = vsyncpa [#allocation15], 0 }
   0xf   :  { %26 = vsyncpa [#allocation18], 0 }
  0x10   :  { %27 = vsyncpa [#allocation4], 0 }
  0x11   :  { %29 = vsyncpa [#allocation4 + $0x1], 0  ;;  %s3286_s13 = smov 0   ;;  %s3288_s14 = smov 0  }
  0x12   :  { %s3290_s15 = smov 0   ;;  %s3292_s16 = smov 0  }
  0x13 LB: > { %4025 = sst [smem:[#allocation28_spill]] %s3193_s13  ;;  %s3207_s17 = smov [#allocation10]   ;;  %s3205_s16 = sphi %s3292_s16, %s4074_s16   ;;  %s3201_s15 = sphi %s3290_s15, %s4078_s15   ;;  %s3197_s14 = sphi %s3288_s14, %s4077_s14   ;;  %s3193_s13 = sphi %s3286_s13, %s4076_s13  }
  0x14   : > { %s309_s18 = sshll.u32 %s3207_s17, 4  ;;  %s3307_s19 = sadd.s32 4294967295, %s3205_s16   ;;  %s3312_s18 = int_to_ptr.vmem [resolvable:$true] %s309_s18 }
  0x15   : > { %4026 = sst [smem:[#allocation29_spill]] %s3307_s19  ;;  %p2355_p0 = scmp.ge.s32.totalorder %s3205_s16, 1 }
  0x16   : > { %p4000_p1 = scmp.eq.s32.totalorder %s3307_s19, 0  ;;  %p296_p2 = scmp.lt.s32.totalorder %s3205_s16, 3 }
  0x17   : > { %s3208_s21 = smov [#allocation11]   ;;  %s3209_s24 = smov [#allocation14]  }
  0x18   : > { %p3314_p3 = pnand %p2355_p0, %p296_p2  ;;  %s320_s22 = sshll.u32 %s3208_s21, 4  ;;  %s3321_s22 = int_to_ptr.vmem [resolvable:$true] %s320_s22 }
  0x19   : > { %s343_s25 = sshll.u32 %s3209_s24, 4  ;;  %s4029_s4 = sld [smem:[#allocation36_spill]]  ;;  %s3329_s25 = int_to_ptr.vmem [resolvable:$true] %s343_s25 }
  0x1a   : > { %s4027_s20 = scalar_select %p3314_p3, 1, 0 }
  0x1b   : > { %p2682_p5 = pneg %p3314_p3 }
  0x1d   : > { %p3325_p6 = pnand %p2682_p5, %p4000_p1 }
  0x1f   : > { %s4028_s23 = scalar_select %p3325_p6, 1, 0 }
  0x20   : > { %s2827_s28 = scalar_lea.hbm %s4029_s4, 16  ;;  %p3339_p8 = pneg %p3325_p6 }
  0x21   : > { %p2828_p7 = scmp.ne.s32.totalorder %s4029_s4, %s2827_s28  ;;  %p2834_p11 = scmp.lt.u32.totalorder %s2827_s28, %s4029_s4 }
  0x22   : > { %s4030_s11 = scalar_select %p3339_p8, 1, 0 }
  0x23   : > { %p2830_p9 = pnand %p3339_p8, %p2828_p7 }
  0x25   : > { %p2831_p10 = pneg %p2830_p9 }
  0x27   : > { %p2836_p12 = pnand %p2834_p11, %p2831_p10 }
  0x29   : > { %2839 = shalt.err (!%p2836_p12)
}
  0x2a   : > { %s2840_s21 = scalar_lea.vmem %s3312_s18, 16  ;;  %s2847_s24 = scalar_lea.vmem %s3312_s18, 32 }
  0x2b   : > { %p2841_p13 = scmp.ne.s32.totalorder %s3312_s18, %s2840_s21  ;;  %p2848_p5 = scmp.lt.s32.totalorder %s3312_s18, %s3312_s18 }
  0x2c   : > { %p2849_p7 = scmp.lt.s32.totalorder %s2847_s24, %s2840_s21 }
  0x2d   : > { %p2843_p0 = pnand %p2841_p13, %p3339_p8 }
  0x2e   : > { %p2850_p9 = por %p2849_p7, %p2848_p5 }
  0x2f   : > { %p2844_p2 = pneg %p2843_p0 }
  0x31   : > { %p2851_p4 = pnand %p2850_p9, %p2844_p2 }
  0x33   : > { %2854 = shalt.err (!%p2851_p4)
}
  0x34   : > { %2685 = dma.hbm_to_vmem [thread:$0]  (!%p3325_p6), %s4029_s4, 16, %s3312_s18, [#allocation9]  }
  0x35   : > { %s4031_s5 = sld [smem:[#allocation37_spill]] }
  0x3b   : > { %s2855_s30 = scalar_lea.hbm %s4031_s5, 16 }
  0x3c   : > { %p2856_p10 = scmp.ne.s32.totalorder %s4031_s5, %s2855_s30  ;;  %p2862_p4 = scmp.lt.u32.totalorder %s2855_s30, %s4031_s5 }
  0x3e   : > { %p2858_p11 = pnand %p2856_p10, %p3339_p8 }
  0x40   : > { %p2859_p12 = pneg %p2858_p11 }
  0x42   : > { %p2864_p13 = pnand %p2862_p4, %p2859_p12 }
  0x44   : > { %2867 = shalt.err (!%p2864_p13)
}
  0x45   : > { %s2868_s18 = scalar_lea.vmem %s3321_s22, 16  ;;  %s2875_s26 = scalar_lea.vmem %s3321_s22, 32 }
  0x46   : > { %p2869_p0 = scmp.ne.s32.totalorder %s3321_s22, %s2868_s18  ;;  %p2876_p7 = scmp.lt.s32.totalorder %s3321_s22, %s3321_s22 }
  0x47   : > { %p2877_p9 = scmp.lt.s32.totalorder %s2875_s26, %s2868_s18 }
  0x48   : > { %p2871_p2 = pnand %p2869_p0, %p3339_p8 }
  0x49   : > { %p2878_p10 = por %p2877_p9, %p2876_p7 }
  0x4a   : > { %p2872_p5 = pneg %p2871_p2 }
  0x4c   : > { %p2879_p11 = pnand %p2878_p10, %p2872_p5 }
  0x4e   : > { %2882 = shalt.err (!%p2879_p11)
}
  0x4f   : > { %2688 = dma.hbm_to_vmem [thread:$0]  (!%p3325_p6), %s4031_s5, 16, %s3321_s22, [#allocation12]  }
  0x50   : > { %s4032_s7 = sld [smem:[#allocation39_spill]] }
  0x56   : > { %s2883_s12 = scalar_lea.hbm %s4032_s7, 256 }
  0x57   : > { %p2884_p12 = scmp.ne.s32.totalorder %s4032_s7, %s2883_s12  ;;  %p2890_p0 = scmp.lt.u32.totalorder %s2883_s12, %s4032_s7 }
  0x59   : > { %p2886_p4 = pnand %p2884_p12, %p3339_p8 }
  0x5b   : > { %p2887_p13 = pneg %p2886_p4 }
  0x5d   : > { %p2892_p2 = pnand %p2890_p0, %p2887_p13 }
  0x5f   : > { %2895 = shalt.err (!%p2892_p2)
}
  0x60   : > { %s2896_s22 = scalar_lea.vmem %s3329_s25, 256  ;;  %p2904_p10 = scmp.lt.s32.totalorder %s3329_s25, %s3329_s25 }
  0x61   : > { %p2897_p5 = scmp.ne.s32.totalorder %s3329_s25, %s2896_s22  ;;  %p2905_p11 = scmp.lt.s32.totalorder %s2896_s22, %s2896_s22 }
  0x63   : > { %p2899_p7 = pnand %p2897_p5, %p3339_p8  ;;  %p2906_p12 = por %p2905_p11, %p2904_p10 }
  0x65   : > { %p2900_p9 = pneg %p2899_p7 }
  0x67   : > { %p2907_p4 = pnand %p2906_p12, %p2900_p9 }
  0x69   : > { %2910 = shalt.err (!%p2907_p4)
}
  0x6a   : > { %s3991_s26 = smov 64   ;;  %s3993_s27 = smov 4  }
  0x6b   : > { %2694 = dma.hbm_to_vmem [thread:$0]  (!%p3325_p6), %s4032_s7, 256, %s3329_s25, [#allocation15], %s3991_s26, %s3991_s26, %s3993_s27  }
  0x6c   : > { %s2354_s30 = sadd.s32 4294967294, %s3205_s16   ;;  %s3413_s12 = sadd.s32 1, %s3205_s16  }
  0x6d   : > { %4033 = sst [smem:[#allocation30_spill]] %s3413_s12  ;;  %s42_s17 = sadd.s32 1, %s3201_s15 }
  0x6e   : > { %s39_s21 = ssub.s32 %s3205_s16, %s3413_s12  ;;  %p49_p13 = scmp.ne.s32.totalorder %s3201_s15, %s3197_s14 }
  0x6f   : > { %p40_p0 = scmp.eq.s32.totalorder %s39_s21, 0  ;;  %p50_p2 = scmp.eq.s32.totalorder %s3205_s16, 0 }
  0x70   : > { %p55_p5 = scmp.ne.s32.totalorder %s3197_s14, %s3193_s13  ;;  %p283_p7 = scmp.eq.s32.totalorder %s3307_s19, 1 }
  0x71   : > { %s3425_s24 = scalar_select %p40_p0, %s3201_s15, %s42_s17  }
  0x72   : > { %p51_p9 = por %p50_p2, %p49_p13  ;;  %p3429_p10 = por %p4000_p1, %p55_p5 }
  0x73   : > { %4034 = sst [smem:[#allocation31_spill]] %s3425_s24  ;;  %p3433_p11 = por %p283_p7, %p49_p13 }
  0x74   : > { %s4035_s25 = scalar_select %p3429_p10, 1, 0 }
  0x75   : > { %s4037_s18 = scalar_select %p3433_p11, 1, 0 }
  0x76   : > { %4036 = sst [smem:[#allocation32_spill]] %s4035_s25  ;;  %p289_p12 = scmp.eq.s32.totalorder %s2354_s30, 1 }
  0x77   : > { %4038 = sst [smem:[#allocation33_spill]] %s4037_s18  ;;  %p2724_p4 = scmp.lt.s32.totalorder %s3205_s16, 2 }
  0x78   : > { %s3995_s22 = sand.u32 1, %s3201_s15   ;;  %p3439_p3 = por %p289_p12, %p55_p5 }
  0x79   : > { %s3445_s29 = sshll.u32 %s3995_s22, 2  ;;  %s3448_s17 = sshll.u32 %s3205_s16, 6 }
  0x7a   : > { %s4039_s28 = scalar_select %p3439_p3, 1, 0 }
  0x7b   : > { %p3450_p0 = pnand %p2724_p4, %p51_p9  ;;  %s4002_s26 = sand.u32 1, %s3205_s16  }
  0x7c   : > { %4040 = sst [smem:[#allocation34_spill]] %s4039_s28  ;;  %s4042_s1 = sld [smem:[#allocation35_spill]] }
  0x7d   : > { %s4041_s21 = scalar_select %p3450_p0, 1, 0 }
  0x7e   : > { %s403_s22 = scalar_lea.vmem [#allocation5], %s3445_s29  ;;  %s3466_s7 = scalar_lea.sflag [#allocation6], %s4002_s26 }
  0x7f   : > { %s410_s5 = sshll.u32 %s403_s22, 4  ;;  %p3472_p2 = pneg %p3450_p0  ;;  %s3462_s5 = int_to_ptr.vmem [resolvable:$true] %s410_s5 }
  0x81   : > { %s4043_s12 = scalar_select %p3472_p2, 1, 0 }
  0x82   : > { %s3459_s4 = scalar_lea.hbm %s4042_s1, %s3448_s17  ;;  %s2916_s22 = scalar_lea.hbm %s4042_s1, 128 }
  0x83   : > { %s2911_s24 = scalar_lea.hbm %s3459_s4, 64  ;;  %p2917_p9 = scmp.lt.u32.totalorder %s3459_s4, %s4042_s1 }
  0x84   : > { %p2912_p13 = scmp.ne.s32.totalorder %s3459_s4, %s2911_s24  ;;  %p2918_p12 = scmp.lt.u32.totalorder %s2916_s22, %s2911_s24 }
  0x85   : > { %p2920_p1 = scmp.lt.u32.totalorder %s2911_s24, %s3459_s4 }
  0x86   : > { %p2914_p5 = pnand %p3472_p2, %p2912_p13  ;;  %p2919_p4 = por %p2918_p12, %p2917_p9 }
  0x88   : > { %p2915_p7 = pneg %p2914_p5  ;;  %p2921_p3 = por %p2920_p1, %p2919_p4 }
  0x8a   : > { %p2922_p11 = pnand %p2921_p3, %p2915_p7 }
  0x8c   : > { %2925 = shalt.err (!%p2922_p11)
}
  0x8d   : > { %s2926_s26 = scalar_lea.vmem %s3462_s5, 64  ;;  %s3212_s27 = smov [#allocation5]  }
  0x8e   : > { %p2927_p13 = scmp.ne.s32.totalorder %s3462_s5, %s2926_s26  ;;  %s2931_s30 = sshll.u32 %s3212_s27, 4  ;;  %s2932_s30 = int_to_ptr.vmem [resolvable:$false] %s2931_s30 }
  0x8f   : > { %s2933_s13 = scalar_lea.vmem %s2932_s30, 128  ;;  %p2934_p6 = scmp.lt.s32.totalorder %s3462_s5, %s2932_s30 }
  0x90   : > { %p2929_p5 = pnand %p2927_p13, %p3472_p2  ;;  %p2935_p8 = scmp.lt.s32.totalorder %s2933_s13, %s2926_s26 }
  0x92   : > { %p2930_p10 = pneg %p2929_p5  ;;  %p2936_p9 = por %p2935_p8, %p2934_p6 }
  0x94   : > { %p2937_p12 = pnand %p2936_p9, %p2930_p10 }
  0x96   : > { %2940 = shalt.err (!%p2937_p12)
}
  0x97   : > { %2707 = dma.hbm_to_vmem [thread:$0]  (!%p3450_p0), %s3459_s4, 64, %s3462_s5, %s3466_s7  }
  0x98   : > { %s3213_s24 = smov [#allocation13]   ;;  %s3214_s22 = smov [#allocation16]  }
  0x99   : > { %s330_s28 = sshll.u32 %s3213_s24, 4  ;;  %s356_s1 = sshll.u32 %s3214_s22, 4  ;;  %s331_s28 = int_to_ptr.vmem [resolvable:$true] %s330_s28  ;;  %s3496_s1 = int_to_ptr.vmem [resolvable:$true] %s356_s1 }
  0x9a   : > { %s4044_s6 = sld [smem:[#allocation38_spill]]  ;;  %p4045_p3 = scmp.ne.s32.totalorder %s4030_s11, 0 }
  0xa0   : > { %s2941_s26 = scalar_lea.hbm %s4044_s6, 256 }
  0xa1   : > { %p2942_p1 = scmp.ne.s32.totalorder %s4044_s6, %s2941_s26  ;;  %p2948_p10 = scmp.lt.u32.totalorder %s2941_s26, %s4044_s6 }
  0xa3   : > { %p2944_p6 = pnand %p2942_p1, %p4045_p3 }
  0xa5   : > { %p2945_p8 = pneg %p2944_p6 }
  0xa7   : > { %p2950_p11 = pnand %p2948_p10, %p2945_p8 }
  0xa9   : > { %2953 = shalt.err (!%p2950_p11)
}
  0xaa   : > { %s2954_s5 = scalar_lea.vmem %s331_s28, 256  ;;  %p2962_p5 = scmp.lt.s32.totalorder %s331_s28, %s331_s28 }
  0xab   : > { %p2955_p7 = scmp.ne.s32.totalorder %s331_s28, %s2954_s5  ;;  %p2963_p9 = scmp.lt.s32.totalorder %s2954_s5, %s2954_s5 }
  0xad   : > { %p2957_p4 = pnand %p2955_p7, %p4045_p3  ;;  %p2964_p12 = por %p2963_p9, %p2962_p5 }
  0xaf   : > { %p2958_p13 = pneg %p2957_p4 }
  0xb1   : > { %p2965_p0 = pnand %p2964_p12, %p2958_p13 }
  0xb3   : > { %2968 = shalt.err (!%p2965_p0)
}
  0xb4   : > { %p4046_p1 = scmp.ne.s32.totalorder %s4028_s23, 0  ;;  %s4047_s10 = smov 4  }
  0xb5   : > { %s4048_s24 = smov 64   ;;  %s2969_s26 = scalar_lea.hbm %s3987_s8, 256 }
  0xb6   : > { %2691 = dma.hbm_to_vmem [thread:$0]  (!%p4046_p1), %s4044_s6, 256, %s331_s28, [#allocation12], %s4048_s24, %s4048_s24, %s4047_s10  }
  0xb7   : > { %p2970_p6 = scmp.ne.s32.totalorder %s3987_s8, %s2969_s26  ;;  %p2976_p10 = scmp.lt.u32.totalorder %s2969_s26, %s3987_s8 }
  0xb9   : > { %p2972_p0 = pnand %p2970_p6, %p4045_p3 }
  0xbb   : > { %p2973_p8 = pneg %p2972_p0 }
  0xbd   : > { %p2978_p11 = pnand %p2976_p10, %p2973_p8 }
  0xbf   : > { %2981 = shalt.err (!%p2978_p11)
}
  0xc0   : > { %s2982_s28 = scalar_lea.vmem %s3496_s1, 256  ;;  %p2990_p5 = scmp.lt.s32.totalorder %s3496_s1, %s3496_s1 }
  0xc1   : > { %p2983_p7 = scmp.ne.s32.totalorder %s3496_s1, %s2982_s28  ;;  %p2991_p9 = scmp.lt.s32.totalorder %s2982_s28, %s2982_s28 }
  0xc3   : > { %p2985_p4 = pnand %p2983_p7, %p4045_p3  ;;  %p2992_p12 = por %p2991_p9, %p2990_p5 }
  0xc5   : > { %p2986_p13 = pneg %p2985_p4 }
  0xc7   : > { %p2993_p6 = pnand %p2992_p12, %p2986_p13 }
  0xc9   : > { %2996 = shalt.err (!%p2993_p6)
}
  0xca   : > { %2697 = dma.hbm_to_vmem [thread:$0]  (!%p4046_p1), %s3987_s8, 256, %s3496_s1, [#allocation15], %s4048_s24, %s4048_s24, %s4047_s10  }
  0xcb   : > { %s3215_s22 = smov [#allocation17]   ;;  %s3549_s13 = scalar_lea.hbm %s3979_s0, %s3448_s17 }
  0xcc   : > { %s370_s27 = sshll.u32 %s3215_s22, 4  ;;  %s2997_s28 = scalar_lea.hbm %s3988_s9, 16  ;;  %s371_s27 = int_to_ptr.vmem [resolvable:$true] %s370_s27 }
  0xcd   : > { %p2998_p0 = scmp.ne.s32.totalorder %s3988_s9, %s2997_s28  ;;  %p3004_p11 = scmp.lt.u32.totalorder %s2997_s28, %s3988_s9 }
  0xcf   : > { %p3000_p8 = pnand %p2998_p0, %p4045_p3 }
  0xd1   : > { %p3001_p10 = pneg %p3000_p8 }
  0xd3   : > { %p3006_p7 = pnand %p3004_p11, %p3001_p10 }
  0xd5   : > { %3009 = shalt.err (!%p3006_p7)
}
  0xd6   : > { %s3010_s24 = scalar_lea.vmem %s371_s27, 16  ;;  %s3017_s19 = scalar_lea.vmem %s371_s27, 32 }
  0xd7   : > { %p3011_p4 = scmp.ne.s32.totalorder %s371_s27, %s3010_s24  ;;  %p3018_p9 = scmp.lt.s32.totalorder %s371_s27, %s371_s27 }
  0xd8   : > { %p3019_p12 = scmp.lt.s32.totalorder %s3017_s19, %s3010_s24 }
  0xd9   : > { %p3013_p13 = pnand %p3011_p4, %p4045_p3 }
  0xda   : > { %p3020_p6 = por %p3019_p12, %p3018_p9 }
  0xdb   : > { %p3014_p5 = pneg %p3013_p13 }
  0xdd   : > { %p3021_p2 = pnand %p3020_p6, %p3014_p5 }
  0xdf   : > { %3024 = shalt.err (!%p3021_p2)
}
  0xe0   : > { %2700 = dma.hbm_to_vmem [thread:$0]  (!%p4046_p1), %s3988_s9, 16, %s371_s27, [#allocation18]  }
  0xe1   : > { %s385_s11 = scalar_lea.vmem [#allocation2], %s3445_s29  ;;  %s3576_s23 = scalar_lea.hbm %s3981_s2, %s3448_s17 }
  0xe2   : > { %s392_s18 = sshll.u32 %s385_s11, 4  ;;  %s4049_s26 = sand.u32 1, %s3201_s15   ;;  %s3570_s18 = int_to_ptr.vmem [resolvable:$true] %s392_s18 }
  0xe3   : > { %s382_s4 = scalar_lea.sflag [#allocation3], %s4049_s26  ;;  %s3025_s5 = scalar_lea.hbm %s3549_s13, 64 }
  0xe4   : > { %p3026_p2 = scmp.ne.s32.totalorder %s3549_s13, %s3025_s5  ;;  %p4050_p3 = scmp.ne.s32.totalorder %s4043_s12, 0 }
  0xe5   : > { %s3030_s27 = scalar_lea.hbm %s3979_s0, 128  ;;  %p3031_p1 = scmp.lt.u32.totalorder %s3549_s13, %s3979_s0 }
  0xe6   : > { %p3028_p0 = pnand %p3026_p2, %p4050_p3  ;;  %p3032_p10 = scmp.lt.u32.totalorder %s3030_s27, %s3025_s5 }
  0xe7   : > { %p3034_p7 = scmp.lt.u32.totalorder %s3025_s5, %s3549_s13 }
  0xe8   : > { %p3029_p8 = pneg %p3028_p0  ;;  %p3033_p11 = por %p3032_p10, %p3031_p1 }
  0xea   : > { %p3035_p4 = por %p3034_p7, %p3033_p11 }
  0xec   : > { %p3036_p13 = pnand %p3035_p4, %p3029_p8 }
  0xee   : > { %3039 = shalt.err (!%p3036_p13)
}
  0xef   : > { %s3040_s19 = scalar_lea.vmem %s3570_s18, 64  ;;  %s3216_s6 = smov [#allocation2]  }
  0xf0   : > { %p3041_p5 = scmp.ne.s32.totalorder %s3570_s18, %s3040_s19  ;;  %s3045_s25 = sshll.u32 %s3216_s6, 4  ;;  %s3046_s25 = int_to_ptr.vmem [resolvable:$false] %s3045_s25 }
  0xf1   : > { %s3047_s11 = scalar_lea.vmem %s3046_s25, 128  ;;  %p3048_p6 = scmp.lt.s32.totalorder %s3570_s18, %s3046_s25 }
  0xf2   : > { %p3043_p9 = pnand %p3041_p5, %p4050_p3  ;;  %p3049_p2 = scmp.lt.s32.totalorder %s3047_s11, %s3040_s19 }
  0xf4   : > { %p3044_p12 = pneg %p3043_p9  ;;  %p3050_p0 = por %p3049_p2, %p3048_p6 }
  0xf6   : > { %p3051_p1 = pnand %p3050_p0, %p3044_p12 }
  0xf8   : > { %3054 = shalt.err (!%p3051_p1)
}
  0xf9   : > { %p4051_p8 = scmp.ne.s32.totalorder %s4041_s21, 0  ;;  %s421_s22 = scalar_lea.vmem [#allocation7], %s3445_s29 }
  0xfa   : > { %s428_s30 = sshll.u32 %s421_s22, 4  ;;  %s3606_s28 = scalar_lea.hbm %s3982_s3, %s3448_s17  ;;  %s429_s30 = int_to_ptr.vmem [resolvable:$true] %s428_s30 }
  0xfb   : > { %2704 = dma.hbm_to_vmem [thread:$0]  (!%p4051_p8), %s3549_s13, 64, %s3570_s18, %s382_s4  }
  0xfc   : > { %s3055_s1 = scalar_lea.hbm %s3576_s23, 64  ;;  %s3060_s24 = scalar_lea.hbm %s3981_s2, 128 }
  0xfd   : > { %p3056_p10 = scmp.ne.s32.totalorder %s3576_s23, %s3055_s1  ;;  %p3061_p4 = scmp.lt.u32.totalorder %s3576_s23, %s3981_s2 }
  0xfe   : > { %p3062_p13 = scmp.lt.u32.totalorder %s3060_s24, %s3055_s1  ;;  %p3064_p9 = scmp.lt.u32.totalorder %s3055_s1, %s3576_s23 }
  0xff   : > { %p3058_p11 = pnand %p3056_p10, %p4050_p3 }
 0x100   : > { %p3063_p5 = por %p3062_p13, %p3061_p4 }
 0x101   : > { %p3059_p7 = pneg %p3058_p11 }
 0x102   : > { %p3065_p12 = por %p3064_p9, %p3063_p5 }
 0x104   : > { %p3066_p6 = pnand %p3065_p12, %p3059_p7 }
 0x106   : > { %3069 = shalt.err (!%p3066_p6)
}
 0x107   : > { %s3070_s17 = scalar_lea.vmem %s429_s30, 64  ;;  %s3217_s13 = smov [#allocation7]  }
 0x108   : > { %p3071_p2 = scmp.ne.s32.totalorder %s429_s30, %s3070_s17  ;;  %s3075_s18 = sshll.u32 %s3217_s13, 4  ;;  %s3076_s18 = int_to_ptr.vmem [resolvable:$false] %s3075_s18 }
 0x109   : > { %s3077_s4 = scalar_lea.vmem %s3076_s18, 128  ;;  %p3078_p10 = scmp.lt.s32.totalorder %s429_s30, %s3076_s18 }
 0x10a   : > { %p3073_p0 = pnand %p3071_p2, %p4050_p3  ;;  %p3079_p11 = scmp.lt.s32.totalorder %s3077_s4, %s3070_s17 }
 0x10c   : > { %p3074_p1 = pneg %p3073_p0  ;;  %p3080_p8 = por %p3079_p11, %p3078_p10 }
 0x10e   : > { %p3081_p4 = pnand %p3080_p8, %p3074_p1 }
 0x110   : > { %3084 = shalt.err (!%p3081_p4)
}
 0x111   : > { %p4052_p13 = scmp.ne.s32.totalorder %s4041_s21, 0  ;;  %s439_s25 = scalar_lea.vmem [#allocation8], %s3445_s29 }
 0x112   : > { %s446_s11 = sshll.u32 %s439_s25, 4  ;;  %s4053_s22 = sand.u32 1, %s3205_s16   ;;  %s447_s11 = int_to_ptr.vmem [resolvable:$true] %s446_s11 }
 0x113   : > { %2710 = dma.hbm_to_vmem [thread:$0]  (!%p4052_p13), %s3576_s23, 64, %s429_s30, %s3466_s7  }
 0x114   : > { %s436_s26 = scalar_lea.sflag [#allocation9], %s4053_s22  ;;  %s3085_s5 = scalar_lea.hbm %s3606_s28, 64 }
 0x115   : > { %p3086_p8 = scmp.ne.s32.totalorder %s3606_s28, %s3085_s5  ;;  %s3090_s10 = scalar_lea.hbm %s3982_s3, 128 }
 0x116   : > { %p3091_p9 = scmp.lt.u32.totalorder %s3606_s28, %s3982_s3  ;;  %p3092_p12 = scmp.lt.u32.totalorder %s3090_s10, %s3085_s5 }
 0x117   : > { %p3088_p7 = pnand %p3086_p8, %p4050_p3  ;;  %p3094_p2 = scmp.lt.u32.totalorder %s3085_s5, %s3606_s28 }
 0x118   : > { %p3093_p6 = por %p3092_p12, %p3091_p9 }
 0x119   : > { %p3089_p5 = pneg %p3088_p7 }
 0x11a   : > { %p3095_p0 = por %p3094_p2, %p3093_p6 }
 0x11c   : > { %p3096_p1 = pnand %p3095_p0, %p3089_p5 }
 0x11e   : > { %3099 = shalt.err (!%p3096_p1)
}
 0x11f   : > { %s3100_s7 = scalar_lea.vmem %s447_s11, 64  ;;  %s3218_s29 = smov [#allocation8]  }
 0x120   : > { %p3101_p10 = scmp.ne.s32.totalorder %s447_s11, %s3100_s7  ;;  %s3105_s23 = sshll.u32 %s3218_s29, 4  ;;  %s3106_s23 = int_to_ptr.vmem [resolvable:$false] %s3105_s23 }
 0x121   : > { %s3107_s30 = scalar_lea.vmem %s3106_s23, 128  ;;  %p3108_p8 = scmp.lt.s32.totalorder %s447_s11, %s3106_s23 }
 0x122   : > { %p3103_p11 = pnand %p3101_p10, %p4050_p3  ;;  %p3109_p7 = scmp.lt.s32.totalorder %s3107_s30, %s3100_s7 }
 0x124   : > { %p3104_p4 = pneg %p3103_p11  ;;  %p3110_p13 = por %p3109_p7, %p3108_p8 }
 0x126   : > { %p3111_p9 = pnand %p3110_p13, %p3104_p4 }
 0x128   : > { %3114 = shalt.err (!%p3111_p9)
}
 0x129   : > { %p4054_p12 = scmp.ne.s32.totalorder %s4041_s21, 0  ;;  %p4055_p5 = scmp.ne.s32.totalorder %s4027_s20, 0 }
 0x12a   : > { %s4056_s12 = sld [smem:[#allocation32_spill]] (!%p4055_p5)  ;;  %s3649_s6 = sand.u32 (!%p4055_p5), 1, %s3197_s14  }
 0x12b   : > { %2713 = dma.hbm_to_vmem [thread:$0]  (!%p4054_p12), %s3606_s28, 64, %s447_s11, %s436_s26  }
 0x12c   : > { %455 = sbr.rel (%p4055_p5) target bundleno = 5887 (0x16ff), region = 60  ;;  %s3652_s17 = sshll.u32 (!%p4055_p5), %s3649_s6, 2 }
 0x12d   : > { %s458_s13 = scalar_lea.sflag (!%p4055_p5), [#allocation3], %s3649_s6  ;;  %s461_s18 = scalar_lea.vmem (!%p4055_p5), [#allocation2], %s3652_s17 }
 0x130   : > { %p4057_p3 = scmp.ne.s32.totalorder (!%p4055_p5), %s4056_s12, 0 }
 0x133   : > { %3160 = dma.done.wait (%p4057_p3), %s458_s13, 64  }
 0x134   : > { %3162 = vsyncadd (%p4057_p3), %s458_s13, 4294967232  ;;  %s4058_s21 = sld [smem:[#allocation29_spill]]  ;;  %s470_s4 = scalar_lea.vmem [#allocation5], %s3652_s17 }
 0x13a   : > { %s466_s20 = sand.u32 1, %s4058_s21  }
 0x13b   : > { %s467_s28 = scalar_lea.sflag [#allocation6], %s466_s20 }
 0x13c   : > { %3164 = dma.done.wait (%p4057_p3), %s467_s28, 128  }
 0x13d   : > { %3166 = vsyncadd (%p4057_p3), %s467_s28, 4294967168  ;;  %s479_s25 = scalar_lea.vmem [#allocation7], %s3652_s17  ;;  %s485_s11 = scalar_lea.sflag [#allocation9], %s466_s20 }
 0x13e   : > { %s488_s22 = scalar_lea.vmem [#allocation8], %s3652_s17 }
 0x13f   : > { %3168 = dma.done.wait (%p4057_p3), %s485_s11, 64  }
 0x140   : > { %3170 = vsyncadd (%p4057_p3), %s485_s11, 4294967232  ;;  %p4059_p13 = scmp.eq.s32.totalorder %s4058_s21, 0 }
 0x142   : > { %3172 = dma.done.wait (%p4059_p13), [#allocation9], 16   ;;  %p4060_p6 = pmov %p4059_p13 }
 0x144   : > { %3174 = vsyncadd (%p4060_p6), [#allocation9], 4294967280  ;;  %p4061_p2 = pmov %p4060_p6 }
 0x146   : > { %3176 = dma.done.wait (%p4061_p2), [#allocation12], 272   ;;  %p4062_p0 = pmov %p4061_p2 }
 0x148   : > { %3178 = vsyncadd (%p4062_p0), [#allocation12], 4294967024  ;;  %p4063_p1 = pmov %p4062_p0 }
 0x149   : > { %p4064_p10 = pmov %p4062_p0 }
 0x14a   : > { %3180 = dma.done.wait (%p4063_p1), [#allocation15], 512  }
 0x14b   : > { %3182 = vsyncadd (%p4064_p10), [#allocation15], 4294966784  ;;  %p4065_p11 = pmov %p4062_p0 }
 0x14c   : > { %p4066_p4 = pmov %p4062_p0 }
 0x14d   : > { %3184 = dma.done.wait (%p4065_p11), [#allocation18], 16  }
 0x14e   : > { %3186 = vsyncadd (%p4066_p4), [#allocation18], 4294967280  ;;  %vm575_vm0 = vcmask 261120   ;;  %v565_v0 = vld [vmem:[%s461_s18] sm:$0xf]  ;;  %v3219_v33 = vmov 0.0  }
 0x14f   : > { %v569_v1 = vld [vmem:[%s479_s25] sm:$0xf]  ;;  %v567_v2 = vld [vmem:[%s470_s4] sm:$0xf]  ;;  %v3688_v3 = vunpack.c.l.bf16 %v565_v0  ;;  %v571_v6 = vld [vmem:[%s488_s22] sm:$0xf]  ;;  %2480 = vmatprep.subr.bf16.mxu0 %v3219_v33  ;;  %2488 = vmatprep.subr.bf16.mxu1 %v3219_v33 }
 0x150   : > { %v570_v4 = vunpack.c.l.bf16 %v569_v1  ;;  %v3690_v5 = vunpack.c.l.bf16 %v567_v2  ;;  %v572_v7 = vunpack.c.l.bf16 %v571_v6  ;;  %v2783_v32 = vld [vmem:[#allocation13] sm:$0xff]   ;;  %v2784_v34 = vld [vmem:[#allocation13 + $0x8] sm:$0xff]   ;;  %v3707_v35 = vld [vmem:[#allocation14] sm:$0xff]   ;;  %vm3220_vm1 = vmmov 0   ;;  %s3221_s26 = smov 120   ;;  %s3222_s5 = smov 96  }
 0x151   : > { %v576_v8 = vsel %vm575_vm0, %v3688_v3, 0.0  ;;  %2481 = vmatpush3.bf16.msra.mxu0 %v2783_v32  ;;  %2484 = vmatprep.mubr.msk.bf16.mxu0 %vm3220_vm1, %v3219_v33  ;;  %v3716_v36 = vld [vmem:[#allocation14 + $0x8] sm:$0xff]   ;;  %vm813_vm2 = vcmask 1043456   ;;  %vm809_vm3 = vcmask 64512   ;;  %vm857_vm4 = vcmask 130048   ;;  %s3223_s1 = smov 88  }
 0x152   : > { %v582_v9 = vsel %vm575_vm0, %v570_v4, 0.0  ;;  %577 = vadd.xlane.f32.xlu0 %v576_v8  ;;  %v579_v10 = vsel %vm575_vm0, %v3690_v5, 0.0  ;;  %v585_v11 = vsel %vm575_vm0, %v572_v7, 0.0  ;;  %2482 = vmatprep.subr.bf16.mxu0 %v3219_v33  ;;  %v2383_v51 = vld [vmem:[#allocation10] ss:$0 sm:$0xff]  ;;  %s3224_s27 = smov 112  }
 0x153   : > { %583 = vadd.xlane.f32.xlu1 %v582_v9  ;;  %2492 = vmatprep.mubr.msk.bf16.mxu1 %vm3220_vm1, %v3219_v33  ;;  %v2384_v57 = vld [vmem:[#allocation11] ss:$0 sm:$0xff]  ;;  %s3225_s10 = smov 104   ;;  %s3226_s24 = smov 80   ;;  %vm2139_vm5 = vcmask 257024  }
 0x154   : > { %2489 = vmatpush3.bf16.msra.mxu1 %v3707_v35  ;;  %s3227_s19 = smov 72   ;;  %s2382_s7 = sshll.u32 %s3649_s6, 3 }
 0x155   : > { %2483 = vmatpush3.bf16.msra.mxu0 %v2784_v34  ;;  %2490 = vmatprep.subr.bf16.mxu1 %v3219_v33  ;;  %s3843_s29 = scalar_lea.vmem [#allocation19], %s2382_s7  ;;  %s4067_s23 = sld [smem:[#allocation33_spill]] }
 0x156   : > { %580 = vadd.xlane.f32.xlu0 %v579_v10  ;;  %2496 = vmatprep.subr.bf16.mxu0 %v3219_v33  ;;  %s2422_s30 = sshll.u32 %s4058_s21, 7  ;;  %s2158_s12 = sshll.u32 %s3843_s29, 4  ;;  %s3933_s12 = int_to_ptr.vmem [resolvable:$true] %s2158_s12 }
 0x157   : > { %586 = vadd.xlane.f32.xlu1 %v585_v11  ;;  %s4068_s18 = sld [smem:[#allocation40_spill]]  ;;  %s2145_s28 = scalar_lea.sflag [#allocation4], %s3649_s6 }
 0x158   : > { %2491 = vmatpush3.bf16.msra.mxu1 %v3716_v36  ;;  %s3115_s4 = scalar_lea.vmem %s3933_s12, 128  ;;  %s3228_s21 = smov [#allocation19]  }
 0x159   : > { %2502 = vmatprep.subr.bf16.mxu1 %v3219_v33  ;;  %p3116_p8 = scmp.ne.s32.totalorder %s3933_s12, %s3115_s4  ;;  %s3119_s25 = sshll.u32 %s3228_s21, 4  ;;  %s3120_s25 = int_to_ptr.vmem [resolvable:$false] %s3119_s25 }
 0x15a   : > { %s3121_s11 = scalar_lea.vmem %s3120_s25, 256  ;;  %p3122_p5 = scmp.lt.s32.totalorder %s3933_s12, %s3120_s25 }
 0x15b   : > { %p4069_p7 = scmp.ne.s32.totalorder %s4067_s23, 0  ;;  %p3123_p3 = scmp.lt.s32.totalorder %s3121_s11, %s3115_s4 }
 0x15d   : > { %s3931_s20 = scalar_lea.hbm %s4068_s18, %s2422_s30  ;;  %p3117_p9 = pnand %p3116_p8, %p4069_p7 }
 0x15e   : > { %p3124_p13 = por %p3123_p3, %p3122_p5 }
 0x15f   : > { %p3118_p12 = pneg %p3117_p9 }
 0x161   : > { %p3125_p6 = pnand %p3124_p13, %p3118_p12 }
 0x1df   : > { %v578_v12 = vpop.xlane.xlu0 %577 }
 0x1e0   : > { %v584_v13 = vpop.xlane.xlu1 %583  ;;  %v589_v14 = vmul.f32 0.03125, %v578_v12 }
 0x1e1   : > { %v591_v15 = vmul.f32 0.03125, %v584_v13 }
 0x1e2   : > { %v593_v16 = vsub.f32 %v3688_v3, %v589_v14 }
 0x1e3   : > { %v595_v17 = vsub.f32 %v570_v4, %v591_v15  ;;  %v581_v18 = vpop.xlane.xlu0 %580 }
 0x1e4   : > { %v587_v19 = vpop.xlane.xlu1 %586  ;;  %v590_v20 = vmul.f32 0.03125, %v581_v18  ;;  %v597_v22 = vmul.f32 %v593_v16, %v593_v16 }
 0x1e5   : > { %v592_v21 = vmul.f32 0.03125, %v587_v19  ;;  %v599_v23 = vmul.f32 %v595_v17, %v595_v17 }
 0x1e6   : > { %v594_v24 = vsub.f32 %v3690_v5, %v590_v20  ;;  %v601_v26 = vsel %vm575_vm0, %v597_v22, 0.0 }
 0x1e7   : > { %v596_v25 = vsub.f32 %v572_v7, %v592_v21  ;;  %602 = vadd.xlane.f32.xlu0 %v601_v26  ;;  %v607_v27 = vsel %vm575_vm0, %v599_v23, 0.0 }
 0x1e8   : > { %v598_v28 = vmul.f32 %v594_v24, %v594_v24 }
 0x1e9   : > { %v600_v29 = vmul.f32 %v596_v25, %v596_v25 }
 0x1ea   : > { %v604_v30 = vsel %vm575_vm0, %v598_v28, 0.0 }
 0x1eb   : > { %608 = vadd.xlane.f32.xlu0 %v607_v27  ;;  %605 = vadd.xlane.f32.xlu1 %v604_v30  ;;  %v610_v31 = vsel %vm575_vm0, %v600_v29, 0.0 }
 0x1ef   : > { %611 = vadd.xlane.f32.xlu1 %v610_v31 }
 0x274   : > { %v603_v37 = vpop.xlane.xlu0 %602 }
 0x275   : > { %v613_v38 = vmul.f32 0.03125, %v603_v37 }
 0x277   : > { %v617_v39 = vadd.f32 1e-05, %v613_v38 }
 0x278   : > { %v606_v40 = vpop.xlane.xlu1 %605  ;;  %v609_v41 = vpop.xlane.xlu0 %608 }
 0x279   : > { %2787 = vrsqrt.f32 %v617_v39  ;;  %v614_v42 = vmul.f32 0.03125, %v606_v40  ;;  %v615_v43 = vmul.f32 0.03125, %v609_v41 }
 0x27b   : > { %v618_v44 = vadd.f32 1e-05, %v614_v42  ;;  %v619_v45 = vadd.f32 1e-05, %v615_v43 }
 0x27c   : > { %v612_v46 = vpop.xlane.xlu1 %611 }
 0x27d   : > { %2789 = vrsqrt.f32 %v618_v44  ;;  %v616_v47 = vmul.f32 0.03125, %v612_v46 }
 0x27e   : > { %2791 = vrsqrt.f32 %v619_v45 }
 0x27f   : > { %v620_v48 = vadd.f32 1e-05, %v616_v47 }
 0x281   : > { %2793 = vrsqrt.f32 %v620_v48 }
 0x283   : > { %v2788_v49 = vpop.eup %2787 }
 0x284   : > { %v625_v50 = vmul.f32 %v2788_v49, %v593_v16 }
 0x286   : > { %v635_v55 = vmul.f32 %v2383_v51, %v625_v50 }
 0x287   : > { %v2790_v52 = vpop.eup %2789 }
 0x288   : > { %v2792_v53 = vpop.eup %2791  ;;  %v626_v54 = vmul.f32 %v2790_v52, %v594_v24  ;;  %v645_v61 = vadd.f32 %v2384_v57, %v635_v55 }
 0x289   : > { %v627_v56 = vmul.f32 %v2792_v53, %v595_v17 }
 0x28a   : > { %v636_v58 = vmul.f32 %v2383_v51, %v626_v54 }
 0x28b   : > { %v2794_v59 = vpop.eup %2793  ;;  %v637_v63 = vmul.f32 %v2383_v51, %v627_v56 }
 0x28c   : > { %v628_v60 = vmul.f32 %v2794_v59, %v596_v25  ;;  %v646_v62 = vadd.f32 %v2384_v57, %v636_v58 }
 0x28d   : > { %v647_v2 = vadd.f32 %v2384_v57, %v637_v63 }
 0x28e   : > { %v658_v0 = vpack.c.bf16 %v646_v62, %v645_v61  ;;  %v638_v1 = vmul.f32 %v2383_v51, %v628_v60  ;;  %v918_v60 = vld [vmem:[#allocation16] sm:$0xf]  ;;  %v1029_v62 = vld [vmem:[#allocation16 + $0x4] sm:$0xf] }
 0x28f   : > { %v3764_v61 = vsel %vm813_vm2, %v918_v60, 0  ;;  %v3769_v63 = vsel %vm813_vm2, %v1029_v62, 0 }
 0x290   : > { %2485 = vmatmul.mubr.msk.bf16.vlgmr.msra.gmra.mrb[0].mxu0 %vm575_vm0, %v658_v0  ;;  %v648_v4 = vadd.f32 %v2384_v57, %v638_v1 }
 0x291   : > { %2498 = vmatprep.mubr.msk.bf16.mxu0 %vm3220_vm1, %v3219_v33 }
 0x292   : > { %v715_v6 = vpack.c.bf16 %v648_v4, %v647_v2 }
 0x294   : > { %2493 = vmatmul.mubr.msk.bf16.vlgmr.msra.gmra.mrb[0].mxu1 %vm575_vm0, %v715_v6 }
 0x295   : > { %2504 = vmatprep.mubr.msk.bf16.mxu1 %vm3220_vm1, %v3219_v33 }
 0x363   : > { %v708_v7 = vpop.f32.mrb[0].mxu0 }
 0x364   : > { %v807_v8 = vmul.f32 0.35355338, %v708_v7  ;;  %v2486_v9 = vpop.f32.mrb[1].mxu0 }
 0x365   : > { %v3726_v10 = vpop.f32.mrb[2].mxu0 }
 0x366   : > { %v3728_v11 = vpack.c.bf16 %v807_v8, %v807_v8  ;;  %v2487_v12 = vpop.f32.mrb[3].mxu0 }
 0x367   : > { %v765_v13 = vpop.f32.mrb[0].mxu1 }
 0x368   : > { %920 = vrot.lane.b32.xlu0 %v3728_v11, %s3221_s26  ;;  %772 = vxpose.xlu1.b32.start [1/2] (short) (narrow) %v765_v13, 32  ;;  %v2494_v14 = vpop.f32.mrb[1].mxu1 }
 0x369   : > { %v768_v15 = vpop.f32.mrb[2].mxu1 }
 0x36a   : > { %v3732_v16 = vpack.c.bf16 %v768_v15, %v765_v13  ;;  %v2495_v17 = vpop.f32.mrb[3].mxu1 }
 0x36c   : > { %773 = vxpose.xlu1.b32.end [2/2] (short) (narrow) %v768_v15, 32 }
 0x3da   : > { %v921_v24 = vpop.permute.xlu0 %920 }
 0x3e8   : > { %v788_v18 = vpop.trf.xlu1 }
 0x3ec   : > { %v789_v19 = vpop.trf.xlu1 }
 0x3ed   : > { %v804_v20 = vpack.c.bf16 %v789_v19, %v788_v18 }
 0x3ef   : > { %v815_v21 = vsel %vm813_vm2, %v804_v20, 0  ;;  %v923_v22 = vrot.slane %v804_v20, 4 }
 0x3f0   : > { %2497 = vmatpush3.bf16.msra.mxu0 %v815_v21  ;;  %v790_v49 = vpop.trf.xlu1 }
 0x3f1   : > { %2508 = vmatprep.subr.bf16.mxu0 %v3219_v33  ;;  %v928_v23 = vsel %vm813_vm2, %v923_v22, 0 }
 0x3f3   : > { %2499 = vmatmul.mubr.msk.bf16.vlgmr.msra.gmra.mrb[4].mxu0 %vm809_vm3, %v3728_v11 }
 0x3f4   : > { %2509 = vmatpush3.bf16.msra.mxu0 %v928_v23  ;;  %2510 = vmatprep.mubr.msk.bf16.mxu0 %vm3220_vm1, %v3219_v33  ;;  %v791_v50 = vpop.trf.xlu1 }
 0x3f5   : > { %2520 = vmatprep.subr.bf16.mxu0 %v3219_v33  ;;  %v805_v7 = vpack.c.bf16 %v791_v50, %v790_v49 }
 0x3f7   : > { %v1128_v14 = vsel %vm813_vm2, %v805_v7, 0 }
 0x3fb   : > { %2511 = vmatmul.mubr.msk.bf16.vlgmr.msra.gmra.mrb[8].mxu0 %vm809_vm3, %v921_v24 }
 0x3fc   : > { %2522 = vmatprep.mubr.msk.bf16.mxu0 %vm3220_vm1, %v3219_v33  ;;  %2521 = vmatpush3.bf16.msra.mxu0 %v3769_v63 }
 0x3fd   : > { %2532 = vmatprep.subr.bf16.mxu0 %v3219_v33 }
 0x4c6   : > { %v851_v25 = vpop.f32.mrb[4].mxu0 }
 0x4c7   : > { %v2500_v26 = vpop.f32.mrb[5].mxu0  ;;  %v858_v27 = vsel %vm857_vm4, %v851_v25, -inf }
 0x4c8   : > { %859 = vmax.xlane.f32.xlu0 %v858_v27  ;;  %v854_v28 = vpop.f32.mrb[6].mxu0 }
 0x4c9   : > { %v2501_v29 = vpop.f32.mrb[7].mxu0 }
 0x4ce   : > { %v964_v30 = vpop.f32.mrb[8].mxu0 }
 0x4cf   : > { %v2512_v31 = vpop.f32.mrb[9].mxu0  ;;  %v970_v32 = vsel %vm857_vm4, %v964_v30, -inf }
 0x4d0   : > { %971 = vmax.xlane.f32.xlu0 %v970_v32  ;;  %v967_v34 = vpop.f32.mrb[10].mxu0 }
 0x4d1   : > { %v2513_v37 = vpop.f32.mrb[11].mxu0 }
 0x4e6   : > { %871 = vrot.lane.b32.xlu0 %v3732_v16, %s3222_s5 }
 0x555   : > { %v860_v38 = vpop.xlane.xlu0 %859 }
 0x556   : > { %v861_v39 = vsub.f32 %v851_v25, %v860_v38 }
 0x558   : > { %v862_v40 = vmul.f32 1.442695, %v861_v39 }
 0x55a   : > { %2795 = vpow2.f32 %v862_v40 }
 0x55d   : > { %v972_v41 = vpop.xlane.xlu0 %971 }
 0x55e   : > { %v973_v42 = vsub.f32 %v964_v30, %v972_v41 }
 0x560   : > { %v974_v43 = vmul.f32 1.442695, %v973_v42 }
 0x561   : > { %v872_v44 = vpop.permute.xlu0 %871 }
 0x562   : > { %2797 = vpow2.f32 %v974_v43  ;;  %2503 = vmatpush3.bf16.msra.mxu1 %v872_v44 }
 0x563   : > { %2514 = vmatprep.subr.bf16.mxu1 %v3219_v33 }
 0x564   : > { %v2796_v45 = vpop.eup %2795 }
 0x565   : > { %v864_v46 = vsel %vm857_vm4, %v2796_v45, 0.0 }
 0x566   : > { %865 = vadd.xlane.f32.xlu1 %v864_v46 }
 0x56c   : > { %v2798_v47 = vpop.eup %2797 }
 0x56d   : > { %v976_v48 = vsel %vm857_vm4, %v2798_v47, 0.0 }
 0x56e   : > { %977 = vadd.xlane.f32.xlu0 %v976_v48 }
 0x584   : > { %982 = vrot.lane.b32.xlu0 %v3732_v16, %s3223_s1 }
 0x588   : > { %1122 = vrot.lane.b32.xlu0 %v3728_v11, %s3224_s27 }
 0x5f3   : > { %v866_v51 = vpop.xlane.xlu1 %865 }
 0x5f4   : > { %2799 = vrcp.f32 %v866_v51 }
 0x5fb   : > { %v978_v52 = vpop.xlane.xlu0 %977 }
 0x5fc   : > { %2801 = vrcp.f32 %v978_v52 }
 0x5fe   : > { %v2800_v53 = vpop.eup %2799 }
 0x5ff   : > { %v868_v54 = vmul.f32 %v2800_v53, %v2796_v45  ;;  %v983_v56 = vpop.permute.xlu0 %982 }
 0x601   : > { %v869_v55 = vpack.c.bf16 %v868_v54, %v868_v54 }
 0x603   : > { %2505 = vmatmul.mubr.msk.bf16.vlgmr.msra.gmra.mrb[4].mxu1 %vm857_vm4, %v869_v55  ;;  %v1123_v17 = vpop.permute.xlu0 %1122 }
 0x604   : > { %2515 = vmatpush3.bf16.msra.mxu1 %v983_v56  ;;  %2516 = vmatprep.mubr.msk.bf16.mxu1 %vm3220_vm1, %v3219_v33 }
 0x605   : > { %2526 = vmatprep.subr.bf16.mxu1 %v3219_v33 }
 0x606   : > { %v2802_v57 = vpop.eup %2801 }
 0x607   : > { %v980_v58 = vmul.f32 %v2802_v57, %v2798_v47  ;;  %v1229_v47 = vld [vmem:[#allocation16 + $0x8] sm:$0xf] }
 0x608   : > { %v3802_v48 = vsel %vm813_vm2, %v1229_v47, 0 }
 0x609   : > { %v981_v59 = vpack.c.bf16 %v980_v58, %v980_v58 }
 0x60b   : > { %2517 = vmatmul.mubr.msk.bf16.vlgmr.msra.gmra.mrb[8].mxu1 %vm857_vm4, %v981_v59 }
 0x60c   : > { %2528 = vmatprep.mubr.msk.bf16.mxu1 %vm3220_vm1, %v3219_v33  ;;  %2527 = vmatpush3.bf16.msra.mxu1 %v3764_v61 }
 0x60d   : > { %2538 = vmatprep.subr.bf16.mxu1 %v3219_v33 }
 0x6d6   : > { %v911_v0 = vpop.f32.mrb[4].mxu1 }
 0x6d7   : > { %v917_v1 = vpack.c.bf16 %v911_v0, %v911_v0  ;;  %v2506_v2 = vpop.f32.mrb[5].mxu1 }
 0x6d8   : > { %v914_v4 = vpop.f32.mrb[6].mxu1 }
 0x6d9   : > { %v2507_v6 = vpop.f32.mrb[7].mxu1  ;;  %2529 = vmatmul.mubr.msk.bf16.vlgmr.msra.gmra.mrb[12].mxu1 %vm809_vm3, %v917_v1  ;;  %v1520_v4 = vmul.f32 0.35355338, %v3726_v10  ;;  %v1386_v10 = vld [vmem:[#allocation16 + $0xc] sm:$0xf] }
 0x6da   : > { %2540 = vmatprep.mubr.msk.bf16.mxu1 %vm3220_vm1, %v3219_v33 }
 0x6db   : > { %v3815_v6 = vpack.c.bf16 %v1520_v4, %v1520_v4 }
 0x6de   : > { %v1022_v8 = vpop.f32.mrb[8].mxu1 }
 0x6df   : > { %v1028_v9 = vpack.c.bf16 %v1022_v8, %v1022_v8  ;;  %v2518_v12 = vpop.f32.mrb[9].mxu1 }
 0x6e0   : > { %v1025_v13 = vpop.f32.mrb[10].mxu1 }
 0x6e1   : > { %v2519_v15 = vpop.f32.mrb[11].mxu1  ;;  %2523 = vmatmul.mubr.msk.bf16.vlgmr.msra.gmra.mrb[12].mxu0 %vm809_vm3, %v1028_v9 }
 0x6e2   : > { %2533 = vmatpush3.bf16.msra.mxu0 %v1128_v14  ;;  %2534 = vmatprep.mubr.msk.bf16.mxu0 %vm3220_vm1, %v3219_v33 }
 0x6e3   : > { %2544 = vmatprep.subr.bf16.mxu0 %v3219_v33 }
 0x6e9   : > { %2535 = vmatmul.mubr.msk.bf16.vlgmr.msra.gmra.mrb[16].mxu0 %vm809_vm3, %v1123_v17 }
 0x6ea   : > { %2546 = vmatprep.mubr.msk.bf16.mxu0 %vm3220_vm1, %v3219_v33  ;;  %2545 = vmatpush3.bf16.msra.mxu0 %v3802_v48 }
 0x6eb   : > { %2556 = vmatprep.subr.bf16.mxu0 %v3219_v33 }
 0x7ac   : > { %v1116_v18 = vpop.f32.mrb[12].mxu1 }
 0x7ad   : > { %v2530_v19 = vpop.f32.mrb[13].mxu1 }
 0x7ae   : > { %v1119_v20 = vpop.f32.mrb[14].mxu1 }
 0x7af   : > { %v2531_v21 = vpop.f32.mrb[15].mxu1 }
 0x7b4   : > { %v1070_v22 = vpop.f32.mrb[12].mxu0 }
 0x7b5   : > { %v3784_v23 = vadd.f32 %v1116_v18, %v1070_v22  ;;  %v2524_v24 = vpop.f32.mrb[13].mxu0  ;;  %v3828_v18 = vsel %vm813_vm2, %v1386_v10, 0 }
 0x7b6   : > { %v1073_v25 = vpop.f32.mrb[14].mxu0 }
 0x7b7   : > { %v2525_v26 = vpop.f32.mrb[15].mxu0 }
 0x7bc   : > { %v1164_v27 = vpop.f32.mrb[16].mxu0 }
 0x7bd   : > { %v2536_v28 = vpop.f32.mrb[17].mxu0  ;;  %v1170_v29 = vsel %vm857_vm4, %v1164_v27, -inf }
 0x7be   : > { %1171 = vmax.xlane.f32.xlu0 %v1170_v29  ;;  %v1167_v30 = vpop.f32.mrb[18].mxu0 }
 0x7bf   : > { %v2537_v31 = vpop.f32.mrb[19].mxu0 }
 0x7d4   : > { %1277 = vrot.lane.b32.xlu0 %v3728_v11, %s3225_s10  ;;  %v1280_v11 = vrot.slane %v805_v7, 4 }
 0x7d6   : > { %v1285_v45 = vsel %vm813_vm2, %v1280_v11, 0 }
 0x84b   : > { %v1172_v32 = vpop.xlane.xlu0 %1171 }
 0x84c   : > { %v1173_v34 = vsub.f32 %v1164_v27, %v1172_v32 }
 0x84e   : > { %v1174_v37 = vmul.f32 1.442695, %v1173_v34 }
 0x84f   : > { %v1278_v46 = vpop.permute.xlu0 %1277 }
 0x850   : > { %2803 = vpow2.f32 %v1174_v37 }
 0x85a   : > { %v2804_v38 = vpop.eup %2803 }
 0x85b   : > { %v1176_v39 = vsel %vm857_vm4, %v2804_v38, 0.0 }
 0x85c   : > { %1177 = vadd.xlane.f32.xlu1 %v1176_v39 }
 0x86d   : > { %1182 = vrot.lane.b32.xlu1 %v3732_v16, %s3226_s24 }
 0x8e9   : > { %v1178_v40 = vpop.xlane.xlu1 %1177 }
 0x8ea   : > { %2805 = vrcp.f32 %v1178_v40 }
 0x8ed   : > { %v1183_v41 = vpop.permute.xlu1 %1182 }
 0x8ee   : > { %2539 = vmatpush3.bf16.msra.mxu1 %v1183_v41 }
 0x8ef   : > { %2550 = vmatprep.subr.bf16.mxu1 %v3219_v33 }
 0x8f4   : > { %v2806_v42 = vpop.eup %2805 }
 0x8f5   : > { %v1180_v43 = vmul.f32 %v2806_v42, %v2804_v38 }
 0x8f7   : > { %v1181_v44 = vpack.c.bf16 %v1180_v43, %v1180_v43 }
 0x8f9   : > { %2541 = vmatmul.mubr.msk.bf16.vlgmr.msra.gmra.mrb[16].mxu1 %vm857_vm4, %v1181_v44 }
 0x8fa   : > { %2551 = vmatpush3.bf16.msra.mxu1 %v1285_v45  ;;  %2552 = vmatprep.mubr.msk.bf16.mxu1 %vm3220_vm1, %v3219_v33 }
 0x8fb   : > { %2562 = vmatprep.subr.bf16.mxu1 %v3219_v33 }
 0x901   : > { %2553 = vmatmul.mubr.msk.bf16.vlgmr.msra.gmra.mrb[20].mxu1 %vm809_vm3, %v1278_v46 }
 0x902   : > { %2564 = vmatprep.mubr.msk.bf16.mxu1 %vm3220_vm1, %v3219_v33  ;;  %2563 = vmatpush3.bf16.msra.mxu1 %v3828_v18 }
 0x903   : > { %2576 = vmatprep.subr.bf16.mxu1 %v3219_v33 }
 0x9cc   : > { %v1222_v49 = vpop.f32.mrb[16].mxu1 }
 0x9cd   : > { %v1228_v50 = vpack.c.bf16 %v1222_v49, %v1222_v49  ;;  %v2542_v51 = vpop.f32.mrb[17].mxu1 }
 0x9ce   : > { %v1225_v52 = vpop.f32.mrb[18].mxu1 }
 0x9cf   : > { %v2543_v53 = vpop.f32.mrb[19].mxu1  ;;  %2547 = vmatmul.mubr.msk.bf16.vlgmr.msra.gmra.mrb[20].mxu0 %vm809_vm3, %v1228_v50 }
 0x9d0   : > { %2558 = vmatprep.mubr.msk.bf16.mxu0 %vm3220_vm1, %v3219_v33 }
 0x9d4   : > { %v1321_v54 = vpop.f32.mrb[20].mxu1 }
 0x9d5   : > { %v2554_v55 = vpop.f32.mrb[21].mxu1  ;;  %v1327_v56 = vsel %vm857_vm4, %v1321_v54, -inf }
 0x9d6   : > { %1328 = vmax.xlane.f32.xlu1 %v1327_v56  ;;  %v1324_v57 = vpop.f32.mrb[22].mxu1 }
 0x9d7   : > { %v2555_v58 = vpop.f32.mrb[23].mxu1 }
 0x9e7   : > { %1339 = vrot.lane.b32.xlu1 %v3732_v16, %s3227_s19 }
 0xa63   : > { %v1329_v59 = vpop.xlane.xlu1 %1328 }
 0xa64   : > { %v1330_v60 = vsub.f32 %v1321_v54, %v1329_v59 }
 0xa66   : > { %v1331_v62 = vmul.f32 1.442695, %v1330_v60 }
 0xa67   : > { %v1340_v0 = vpop.permute.xlu1 %1339 }
 0xa68   : > { %2807 = vpow2.f32 %v1331_v62  ;;  %2557 = vmatpush3.bf16.msra.mxu0 %v1340_v0 }
 0xa69   : > { %2568 = vmatprep.subr.bf16.mxu0 %v3219_v33 }
 0xa72   : > { %v2808_v1 = vpop.eup %2807 }
 0xa73   : > { %v1333_v2 = vsel %vm857_vm4, %v2808_v1, 0.0 }
 0xa74   : > { %1334 = vadd.xlane.f32.xlu0 %v1333_v2 }
 0xa8a   : > { %1631 = vrot.lane.b32.xlu0 %v3815_v6, %s3221_s26 }
 0xaa2   : > { %v1270_v16 = vpop.f32.mrb[20].mxu0 }
 0xaa3   : > { %v1276_v7 = vadd.f32 %v1270_v16, %v3784_v23  ;;  %v2548_v8 = vpop.f32.mrb[21].mxu0 }
 0xaa4   : > { %v1273_v9 = vpop.f32.mrb[22].mxu0 }
 0xaa5   : > { %v2549_v12 = vpop.f32.mrb[23].mxu0 }
 0xb01   : > { %v1335_v13 = vpop.xlane.xlu0 %1334 }
 0xb02   : > { %2809 = vrcp.f32 %v1335_v13 }
 0xb05   : > { %v1632_v43 = vpop.permute.xlu0 %1631 }
 0xb0c   : > { %v2810_v14 = vpop.eup %2809 }
 0xb0d   : > { %v1337_v15 = vmul.f32 %v2810_v14, %v2808_v1 }
 0xb0f   : > { %v1338_v17 = vpack.c.bf16 %v1337_v15, %v1337_v15 }
 0xb11   : > { %2559 = vmatmul.mubr.msk.bf16.vlgmr.msra.gmra.mrb[24].mxu0 %vm857_vm4, %v1338_v17 }
 0xb12   : > { %2569 = vmatpush3.bf16.msra.mxu0 %v3707_v35  ;;  %2572 = vmatprep.mubr.msk.bf16.mxu0 %vm3220_vm1, %v3219_v33 }
 0xb13   : > { %2570 = vmatprep.subr.bf16.mxu0 %v3219_v33 }
 0xb16   : > { %2571 = vmatpush3.bf16.msra.mxu0 %v3716_v36  ;;  %v3835_v36 = vld [vmem:[#allocation17] ss:$0 sm:$0xff] }
 0xb17   : > { %2582 = vmatprep.subr.bf16.mxu0 %v3219_v33 }
 0xbe4   : > { %v1379_v19 = vpop.f32.mrb[24].mxu0 }
 0xbe5   : > { %v1385_v35 = vpack.c.bf16 %v1379_v19, %v1379_v19  ;;  %v2560_v20 = vpop.f32.mrb[25].mxu0 }
 0xbe6   : > { %v1382_v21 = vpop.f32.mrb[26].mxu0 }
 0xbe7   : > { %v2561_v22 = vpop.f32.mrb[27].mxu0  ;;  %2565 = vmatmul.mubr.msk.bf16.vlgmr.msra.gmra.mrb[24].mxu1 %vm809_vm3, %v1385_v35 }
 0xbe8   : > { %2578 = vmatprep.mubr.msk.bf16.mxu1 %vm3220_vm1, %v3219_v33 }
 0xcba   : > { %v1427_v23 = vpop.f32.mrb[24].mxu1 }
 0xcbb   : > { %v1433_v24 = vadd.f32 %v1427_v23, %v1276_v7  ;;  %v2566_v25 = vpop.f32.mrb[25].mxu1 }
 0xcbc   : > { %v1430_v26 = vpop.f32.mrb[26].mxu1 }
 0xcbd   : > { %v1440_v27 = vadd.f32 %v3835_v36, %v1433_v24  ;;  %v2567_v28 = vpop.f32.mrb[27].mxu1 }
 0xcbf   : > { %v1441_v29 = vpack.c.bf16 %v1440_v27, %v1440_v27  ;;  %v2137_v30 = vadd.f32 %v1440_v27, %v3688_v3 }
 0xcc1   : > { %v2138_v31 = vpack.c.bf16 %v2137_v30, %v2137_v30  ;;  %2573 = vmatmul.mubr.msk.bf16.vlgmr.msra.gmra.mrb[28].mxu0 %vm575_vm0, %v1441_v29 }
 0xcc2   : > { %2584 = vmatprep.mubr.msk.bf16.mxu0 %vm3220_vm1, %v3219_v33 }
 0xcc3   : > { %2140 = vst.msk [vmem:[%s3843_s29] sm:$0xf] %vm2139_vm5, %v2138_v31 }
 0xd94   : > { %v1479_v32 = vpop.f32.mrb[28].mxu0 }
 0xd95   : > { %1485 = vxpose.xlu1.b32.start.end [1/1] (short) (narrow) %v1479_v32, 32  ;;  %v2574_v34 = vpop.f32.mrb[29].mxu0 }
 0xd96   : > { %v1482_v37 = vpop.f32.mrb[30].mxu0 }
 0xd97   : > { %v2575_v38 = vpop.f32.mrb[31].mxu0 }
 0xe15   : > { %v1501_v39 = vpop.trf.xlu1 }
 0xe19   : > { %v1502_v40 = vpop.trf.xlu1 }
 0xe1a   : > { %v1517_v3 = vpack.c.bf16 %v1502_v40, %v1501_v39 }
 0xe1c   : > { %v1526_v41 = vsel %vm813_vm2, %v1517_v3, 0  ;;  %v1634_v42 = vrot.slane %v1517_v3, 4 }
 0xe1d   : > { %2577 = vmatpush3.bf16.msra.mxu1 %v1526_v41  ;;  %v1503_v55 = vpop.trf.xlu1 }
 0xe1e   : > { %2588 = vmatprep.subr.bf16.mxu1 %v3219_v33  ;;  %v1639_v11 = vsel %vm813_vm2, %v1634_v42, 0 }
 0xe20   : > { %2579 = vmatmul.mubr.msk.bf16.vlgmr.msra.gmra.mrb[28].mxu1 %vm809_vm3, %v3815_v6 }
 0xe21   : > { %2589 = vmatpush3.bf16.msra.mxu1 %v1639_v11  ;;  %2590 = vmatprep.mubr.msk.bf16.mxu1 %vm3220_vm1, %v3219_v33  ;;  %v1504_v59 = vpop.trf.xlu1 }
 0xe22   : > { %2600 = vmatprep.subr.bf16.mxu1 %v3219_v33  ;;  %v1518_v26 = vpack.c.bf16 %v1504_v59, %v1503_v55 }
 0xe24   : > { %v1834_v30 = vsel %vm813_vm2, %v1518_v26, 0 }
 0xe28   : > { %2591 = vmatmul.mubr.msk.bf16.vlgmr.msra.gmra.mrb[32].mxu1 %vm809_vm3, %v1632_v43 }
 0xe29   : > { %2601 = vmatpush3.bf16.msra.mxu1 %v3769_v63  ;;  %2602 = vmatprep.mubr.msk.bf16.mxu1 %vm3220_vm1, %v3219_v33  ;;  %v3862_v63 = vpack.c.bf16 %v1479_v32, %v1479_v32 }
 0xe2a   : > { %2612 = vmatprep.subr.bf16.mxu1 %v3219_v33 }
 0xef3   : > { %v1562_v44 = vpop.f32.mrb[28].mxu1 }
 0xef4   : > { %v2580_v45 = vpop.f32.mrb[29].mxu1  ;;  %v1568_v46 = vsel %vm809_vm3, %v1562_v44, -inf }
 0xef5   : > { %1569 = vmax.xlane.f32.xlu0 %v1568_v46  ;;  %v1565_v47 = vpop.f32.mrb[30].mxu1 }
 0xef6   : > { %v2581_v49 = vpop.f32.mrb[31].mxu1 }
 0xefb   : > { %v1675_v50 = vpop.f32.mrb[32].mxu1 }
 0xefc   : > { %v2592_v51 = vpop.f32.mrb[33].mxu1  ;;  %v1681_v52 = vsel %vm809_vm3, %v1675_v50, -inf }
 0xefd   : > { %1682 = vmax.xlane.f32.xlu1 %v1681_v52  ;;  %v1678_v53 = vpop.f32.mrb[34].mxu1 }
 0xefe   : > { %v2593_v54 = vpop.f32.mrb[35].mxu1 }
 0xf0b   : > { %1581 = vrot.lane.b32.xlu0 %v3862_v63, %s3222_s5 }
 0xf82   : > { %v1570_v56 = vpop.xlane.xlu0 %1569 }
 0xf83   : > { %v1571_v57 = vsub.f32 %v1562_v44, %v1570_v56 }
 0xf85   : > { %v1572_v58 = vmul.f32 1.442695, %v1571_v57  ;;  %v1984_v57 = vrot.slane %v1518_v26, 4 }
 0xf86   : > { %v1582_v60 = vpop.permute.xlu0 %1581 }
 0xf87   : > { %2811 = vpow2.f32 %v1572_v58  ;;  %v1587_v62 = vsel %vm813_vm2, %v1582_v60, 0  ;;  %v1989_v60 = vsel %vm813_vm2, %v1984_v57, 0 }
 0xf88   : > { %2583 = vmatpush3.bf16.msra.mxu0 %v1587_v62 }
 0xf89   : > { %2594 = vmatprep.subr.bf16.mxu0 %v3219_v33 }
 0xf8a   : > { %v1683_v0 = vpop.xlane.xlu1 %1682 }
 0xf8b   : > { %v1684_v1 = vsub.f32 %v1675_v50, %v1683_v0 }
 0xf8d   : > { %v1685_v2 = vmul.f32 1.442695, %v1684_v1 }
 0xf8f   : > { %2813 = vpow2.f32 %v1685_v2 }
 0xf91   : > { %v2812_v4 = vpop.eup %2811 }
 0xf92   : > { %v1574_v16 = vsel %vm809_vm3, %v2812_v4, 0.0 }
 0xf93   : > { %1575 = vadd.xlane.f32.xlu0 %v1574_v16 }
 0xf99   : > { %v2814_v7 = vpop.eup %2813 }
 0xf9a   : > { %v1687_v8 = vsel %vm809_vm3, %v2814_v7, 0.0 }
 0xf9b   : > { %1688 = vadd.xlane.f32.xlu0 %v1687_v8 }
 0xfb1   : > { %1693 = vrot.lane.b32.xlu0 %v3862_v63, %s3223_s1 }
 0xfb5   : > { %1828 = vrot.lane.b32.xlu0 %v3815_v6, %s3224_s27 }
0x1020   : > { %v1576_v9 = vpop.xlane.xlu0 %1575 }
0x1021   : > { %2815 = vrcp.f32 %v1576_v9 }
0x1028   : > { %v1689_v12 = vpop.xlane.xlu0 %1688 }
0x1029   : > { %2817 = vrcp.f32 %v1689_v12 }
0x102b   : > { %v2816_v13 = vpop.eup %2815 }
0x102c   : > { %v1578_v14 = vmul.f32 %v2816_v13, %v2812_v4  ;;  %v1694_v15 = vpop.permute.xlu0 %1693 }
0x102d   : > { %v1699_v10 = vsel %vm813_vm2, %v1694_v15, 0 }
0x102e   : > { %v1579_v17 = vpack.c.bf16 %v1578_v14, %v1578_v14 }
0x1030   : > { %2585 = vmatmul.mubr.msk.bf16.vlgmr.msra.gmra.mrb[32].mxu0 %vm809_vm3, %v1579_v17  ;;  %v1829_v32 = vpop.permute.xlu0 %1828 }
0x1031   : > { %2595 = vmatpush3.bf16.msra.mxu0 %v1699_v10  ;;  %2596 = vmatprep.mubr.msk.bf16.mxu0 %vm3220_vm1, %v3219_v33 }
0x1032   : > { %2606 = vmatprep.subr.bf16.mxu0 %v3219_v33 }
0x1033   : > { %v2818_v19 = vpop.eup %2817 }
0x1034   : > { %v1691_v35 = vmul.f32 %v2818_v19, %v2814_v7 }
0x1036   : > { %v1692_v20 = vpack.c.bf16 %v1691_v35, %v1691_v35 }
0x1038   : > { %2597 = vmatmul.mubr.msk.bf16.vlgmr.msra.gmra.mrb[36].mxu0 %vm809_vm3, %v1692_v20 }
0x1039   : > { %2607 = vmatpush3.bf16.msra.mxu0 %v3764_v61  ;;  %2608 = vmatprep.mubr.msk.bf16.mxu0 %vm3220_vm1, %v3219_v33 }
0x103a   : > { %2618 = vmatprep.subr.bf16.mxu0 %v3219_v33 }
0x1103   : > { %v1623_v21 = vpop.f32.mrb[32].mxu0 }
0x1104   : > { %v1629_v22 = vpack.c.bf16 %v1623_v21, %v1623_v21  ;;  %v2586_v23 = vpop.f32.mrb[33].mxu0 }
0x1105   : > { %v1626_v24 = vpop.f32.mrb[34].mxu0 }
0x1106   : > { %v2587_v25 = vpop.f32.mrb[35].mxu0  ;;  %2609 = vmatmul.mubr.msk.bf16.vlgmr.msra.gmra.mrb[40].mxu0 %vm809_vm3, %v1629_v22 }
0x1107   : > { %2620 = vmatprep.mubr.msk.bf16.mxu0 %vm3220_vm1, %v3219_v33 }
0x110b   : > { %v1735_v27 = vpop.f32.mrb[36].mxu0 }
0x110c   : > { %v1741_v28 = vpack.c.bf16 %v1735_v27, %v1735_v27  ;;  %v2598_v29 = vpop.f32.mrb[37].mxu0 }
0x110d   : > { %v1738_v61 = vpop.f32.mrb[38].mxu0 }
0x110e   : > { %v2599_v31 = vpop.f32.mrb[39].mxu0  ;;  %2603 = vmatmul.mubr.msk.bf16.vlgmr.msra.gmra.mrb[36].mxu1 %vm809_vm3, %v1741_v28 }
0x110f   : > { %2613 = vmatpush3.bf16.msra.mxu1 %v1834_v30  ;;  %2614 = vmatprep.mubr.msk.bf16.mxu1 %vm3220_vm1, %v3219_v33 }
0x1110   : > { %2624 = vmatprep.subr.bf16.mxu1 %v3219_v33 }
0x1116   : > { %2615 = vmatmul.mubr.msk.bf16.vlgmr.msra.gmra.mrb[40].mxu1 %vm809_vm3, %v1829_v32 }
0x1117   : > { %2625 = vmatpush3.bf16.msra.mxu1 %v3802_v48  ;;  %2626 = vmatprep.mubr.msk.bf16.mxu1 %vm3220_vm1, %v3219_v33 }
0x1118   : > { %2636 = vmatprep.subr.bf16.mxu1 %v3219_v33 }
0x11d9   : > { %v1822_v34 = vpop.f32.mrb[40].mxu0 }
0x11da   : > { %v2610_v37 = vpop.f32.mrb[41].mxu0 }
0x11db   : > { %v1825_v38 = vpop.f32.mrb[42].mxu0 }
0x11dc   : > { %v2611_v39 = vpop.f32.mrb[43].mxu0 }
0x11e1   : > { %v1779_v40 = vpop.f32.mrb[36].mxu1 }
0x11e2   : > { %v1823_v3 = vadd.f32 %v1822_v34, %v1779_v40  ;;  %v2604_v41 = vpop.f32.mrb[37].mxu1 }
0x11e3   : > { %v1782_v42 = vpop.f32.mrb[38].mxu1 }
0x11e4   : > { %v2605_v11 = vpop.f32.mrb[39].mxu1 }
0x11e9   : > { %v1870_v43 = vpop.f32.mrb[40].mxu1 }
0x11ea   : > { %v2616_v44 = vpop.f32.mrb[41].mxu1  ;;  %v1876_v45 = vsel %vm809_vm3, %v1870_v43, -inf }
0x11eb   : > { %1877 = vmax.xlane.f32.xlu0 %v1876_v45  ;;  %v1873_v48 = vpop.f32.mrb[42].mxu1 }
0x11ec   : > { %v2617_v46 = vpop.f32.mrb[43].mxu1 }
0x1278   : > { %v1878_v47 = vpop.xlane.xlu0 %1877 }
0x1279   : > { %v1879_v49 = vsub.f32 %v1870_v43, %v1878_v47 }
0x127b   : > { %v1880_v50 = vmul.f32 1.442695, %v1879_v49 }
0x127d   : > { %2819 = vpow2.f32 %v1880_v50 }
0x1287   : > { %v2820_v51 = vpop.eup %2819 }
0x1288   : > { %v1882_v52 = vsel %vm809_vm3, %v2820_v51, 0.0 }
0x1289   : > { %1883 = vadd.xlane.f32.xlu1 %v1882_v52 }
0x129a   : > { %1888 = vrot.lane.b32.xlu1 %v3862_v63, %s3226_s24 }
0x129e   : > { %1981 = vrot.lane.b32.xlu1 %v3815_v6, %s3225_s10 }
0x1316   : > { %v1884_v53 = vpop.xlane.xlu1 %1883 }
0x1317   : > { %2821 = vrcp.f32 %v1884_v53 }
0x131a   : > { %v1889_v54 = vpop.permute.xlu1 %1888 }
0x131b   : > { %v1894_v55 = vsel %vm813_vm2, %v1889_v54, 0 }
0x131c   : > { %2619 = vmatpush3.bf16.msra.mxu0 %v1894_v55 }
0x131d   : > { %2630 = vmatprep.subr.bf16.mxu0 %v3219_v33 }
0x131e   : > { %v1982_v6 = vpop.permute.xlu1 %1981 }
0x1321   : > { %v2822_v56 = vpop.eup %2821 }
0x1322   : > { %v1886_v58 = vmul.f32 %v2822_v56, %v2820_v51 }
0x1324   : > { %v1887_v59 = vpack.c.bf16 %v1886_v58, %v1886_v58 }
0x1326   : > { %2621 = vmatmul.mubr.msk.bf16.vlgmr.msra.gmra.mrb[44].mxu0 %vm809_vm3, %v1887_v59 }
0x1327   : > { %2631 = vmatpush3.bf16.msra.mxu0 %v1989_v60  ;;  %2632 = vmatprep.mubr.msk.bf16.mxu0 %vm3220_vm1, %v3219_v33 }
0x1328   : > { %2642 = vmatprep.subr.bf16.mxu0 %v3219_v33 }
0x132e   : > { %2633 = vmatmul.mubr.msk.bf16.vlgmr.msra.gmra.mrb[48].mxu0 %vm809_vm3, %v1982_v6 }
0x132f   : > { %2643 = vmatpush3.bf16.msra.mxu0 %v3828_v18  ;;  %2644 = vmatprep.mubr.msk.bf16.mxu0 %vm3220_vm1, %v3219_v33 }
0x13f9   : > { %v1930_v62 = vpop.f32.mrb[44].mxu0 }
0x13fa   : > { %v1936_v0 = vpack.c.bf16 %v1930_v62, %v1930_v62  ;;  %v2622_v1 = vpop.f32.mrb[45].mxu0 }
0x13fb   : > { %v1933_v2 = vpop.f32.mrb[46].mxu0 }
0x13fc   : > { %v2623_v4 = vpop.f32.mrb[47].mxu0  ;;  %2627 = vmatmul.mubr.msk.bf16.vlgmr.msra.gmra.mrb[44].mxu1 %vm809_vm3, %v1936_v0 }
0x13fd   : > { %2638 = vmatprep.mubr.msk.bf16.mxu1 %vm3220_vm1, %v3219_v33 }
0x1401   : > { %v2025_v16 = vpop.f32.mrb[48].mxu0 }
0x1402   : > { %v2634_v7 = vpop.f32.mrb[49].mxu0  ;;  %v2031_v8 = vsel %vm809_vm3, %v2025_v16, -inf }
0x1403   : > { %2032 = vmax.xlane.f32.xlu1 %v2031_v8  ;;  %v2028_v9 = vpop.f32.mrb[50].mxu0 }
0x1404   : > { %v2635_v18 = vpop.f32.mrb[51].mxu0 }
0x1490   : > { %v2033_v12 = vpop.xlane.xlu1 %2032 }
0x1491   : > { %v2034_v13 = vsub.f32 %v2025_v16, %v2033_v12 }
0x1493   : > { %v2035_v14 = vmul.f32 1.442695, %v2034_v13 }
0x1495   : > { %2823 = vpow2.f32 %v2035_v14 }
0x149f   : > { %v2824_v15 = vpop.eup %2823 }
0x14a0   : > { %v2037_v17 = vsel %vm809_vm3, %v2824_v15, 0.0 }
0x14a1   : > { %2038 = vadd.xlane.f32.xlu0 %v2037_v17 }
0x14b7   : > { %2043 = vrot.lane.b32.xlu0 %v3862_v63, %s3227_s19 }
0x14cf   : > { %v1974_v10 = vpop.f32.mrb[44].mxu1 }
0x14d0   : > { %v1980_v33 = vadd.f32 %v1974_v10, %v1823_v3  ;;  %v2628_v19 = vpop.f32.mrb[45].mxu1 }
0x14d1   : > { %v1977_v35 = vpop.f32.mrb[46].mxu1 }
0x14d2   : > { %v2629_v20 = vpop.f32.mrb[47].mxu1 }
0x152e   : > { %v2039_v21 = vpop.xlane.xlu0 %2038 }
0x152f   : > { %2825 = vrcp.f32 %v2039_v21 }
0x1532   : > { %v2044_v22 = vpop.permute.xlu0 %2043 }
0x1533   : > { %v2049_v23 = vsel %vm813_vm2, %v2044_v22, 0 }
0x1534   : > { %2637 = vmatpush3.bf16.msra.mxu1 %v2049_v23 }
0x1539   : > { %v2826_v24 = vpop.eup %2825 }
0x153a   : > { %v2041_v25 = vmul.f32 %v2826_v24, %v2824_v15 }
0x153c   : > { %v2042_v26 = vpack.c.bf16 %v2041_v25, %v2041_v25 }
0x153e   : > { %2639 = vmatmul.mubr.msk.bf16.vlgmr.msra.gmra.mrb[48].mxu1 %vm809_vm3, %v2042_v26 }
0x1611   : > { %v2085_v27 = vpop.f32.mrb[48].mxu1 }
0x1612   : > { %v2091_v63 = vpack.c.bf16 %v2085_v27, %v2085_v27  ;;  %v2640_v28 = vpop.f32.mrb[49].mxu1 }
0x1613   : > { %v2088_v29 = vpop.f32.mrb[50].mxu1 }
0x1614   : > { %v2641_v61 = vpop.f32.mrb[51].mxu1  ;;  %2645 = vmatmul.mubr.msk.bf16.vlgmr.msra.gmra.mrb[52].mxu0 %vm809_vm3, %v2091_v63 }
0x16e7   : > { %v2129_v30 = vpop.f32.mrb[52].mxu0 }
0x16e8   : > { %v2135_v31 = vadd.f32 %v2129_v30, %v1980_v33  ;;  %v2646_v32 = vpop.f32.mrb[53].mxu0 }
0x16e9   : > { %v2132_v34 = vpop.f32.mrb[54].mxu0 }
0x16ea   : > { %v2136_v37 = vadd.f32 %v3835_v36, %v2135_v31  ;;  %v2647_v38 = vpop.f32.mrb[55].mxu0 }
0x16ec   : > { %v2141_v39 = vadd.f32 %v2136_v37, %v3690_v5 }
0x16ee   : > { %v2142_v40 = vpack.c.bf16 %v2141_v39, %v2141_v39 }
0x16f0   : > { %2143 = vst.msk [vmem:[%s3843_s29 + $0x4] sm:$0xf] %vm2139_vm5, %v2142_v40 }
0x16f1   : > { %3128 = shalt.err (!%p3125_p6)
}
0x16f2   : > { %s3129_s22 = scalar_lea.hbm %s3931_s20, 128  ;;  %s3133_s1 = scalar_lea.hbm %s4068_s18, 256 }
0x16f3   : > { %p3130_p2 = scmp.ne.s32.totalorder %s3931_s20, %s3129_s22  ;;  %p3134_p10 = scmp.lt.u32.totalorder %s3931_s20, %s4068_s18 }
0x16f4   : > { %p3135_p11 = scmp.lt.u32.totalorder %s3133_s1, %s3129_s22  ;;  %p3137_p8 = scmp.lt.u32.totalorder %s3129_s22, %s3931_s20 }
0x16f5   : > { %p3131_p0 = pnand %p3130_p2, %p4069_p7 }
0x16f6   : > { %p3136_p4 = por %p3135_p11, %p3134_p10 }
0x16f7   : > { %p3132_p1 = pneg %p3131_p0 }
0x16f8   : > { %p3138_p9 = por %p3137_p8, %p3136_p4 }
0x16fa   : > { %p3139_p12 = pnand %p3138_p9, %p3132_p1 }
0x16fc   : > { %3142 = shalt.err (!%p3139_p12)
}
0x16fd   : > { %s3229_s24 = smov 64   ;;  %s3230_s19 = smov 4  }
0x16fe   : > { %2680 = dma.vmem_to_hbm [thread:$0]  (%p4069_p7), %s3933_s12, 128, %s3931_s20, %s2145_s28, %s3229_s24, %s3229_s24, %s3230_s19  }
0x16ff PF: > { %s4070_s7 = sld [smem:[#allocation28_spill]]  ;;  %s4071_s29 = sld [smem:[#allocation34_spill]] }
0x1700   : > { %p4073_p3 = scmp.ge.s32.totalorder %s3205_s16, 2 }
0x1705   : > { %s2173_s30 = sand.u32 1, %s4070_s7   ;;  %p4072_p5 = scmp.ne.s32.totalorder %s4071_s29, 0 }
0x1706   : > { %s2174_s17 = scalar_lea.sflag [#allocation4], %s2173_s30 }
0x1707   : > { %p2715_p13 = pnand %p4073_p3, %p4072_p5 }
0x1709   : > { %3188 = dma.done.wait (!%p2715_p13), %s2174_s17, 128  }
0x170a   : > { %3190 = vsyncadd (!%p2715_p13), %s2174_s17, 4294967168  ;;  %s4074_s16 = sld [smem:[#allocation30_spill]]  ;;  %s4075_s4 = sld [smem:[#allocation31_spill]] }
0x170b   : > { %s4076_s13 = smov %s3197_s14  ;;  %s4077_s14 = smov %s3201_s15 }
0x1710   : > { %p32_p6 = scmp.ge.s32.totalorder %s4074_s16, 4   ;;  %s4078_s15 = smov %s4075_s4 }
0x1712   :  { %34 = sbr.rel (!%p32_p6) target bundleno = 19 (0x13), region = 166 }
0x1719   :  { %2179 = vsyncpa [#allocation3], 1 }
0x171a   :  { %2181 = vsyncpa [#allocation3 + $0x1], 1 }
0x171b   :  { %2182 = vsyncpa [#allocation6], 1 }
0x171c   :  { %2184 = vsyncpa [#allocation6 + $0x1], 1 }
0x171d   :  { %2185 = vsyncpa [#allocation9], 1 }
0x171e   :  { %2187 = vsyncpa [#allocation9 + $0x1], 1 }
0x171f   :  { %2188 = vsyncpa [#allocation12], 1 }
0x1720   :  { %2189 = vsyncpa [#allocation15], 1 }
0x1721   :  { %2190 = vsyncpa [#allocation18], 1 }
0x1722   :  { %2191 = vsyncpa [#allocation4], 1 }
0x1723   :  { %2193 = vsyncpa [#allocation4 + $0x1], 1 }

</bundles_post_ra>
